<compile_context>
chip_gen: v5e
topology: v5e:2x2
jax: 0.10.0
libtpu: 0.0.40
codegen_flags: <defaults>
</compile_context>

<pallas_src>
import math

import jax
import jax.numpy as jnp
from jax import lax
from jax.experimental import pallas as pl
from jax.experimental.pallas import tpu as pltpu

STATE_DIM = 128
HIDDEN_DIM = 256
ACTION_DIM = 25          # len(ActionSpace)
HEAD_PAD = 128           # fused actor+critic head padded to one full lane group
NEG_BIG = -1e30

# Row offsets inside the packed (640, 256) bf16 body-weight slab.
_W1_OFF = 0
_W2_OFF = STATE_DIM                       # 128
_W3_OFF = STATE_DIM + HIDDEN_DIM          # 384
_WB_ROWS = STATE_DIM + 2 * HIDDEN_DIM     # 640


def _policy_kernel(x_ref, wb_ref, wh_ref, b_ref, out_ref):
    """One batch tile of the full policy MLP.

    x_ref  : (TB, 128)  f32   state tile
    wb_ref : (640, 256) bf16  packed body weights [w1; w2; w3]
    wh_ref : (256, 128) bf16  fused head weights (actor lanes 0..24, critic lane 25)
    b_ref  : (8, 256)   f32   packed biases [b1; b2; b3; b_head; 4 pad rows]
    out_ref: (TB, 128)        lanes 0..24 = action probs, lane 25 = state value
    """
    b_all = b_ref[...]
    b1 = b_all[0:1, :]
    b2 = b_all[1:2, :]
    b3 = b_all[2:3, :]
    bh = b_all[3:4, 0:HEAD_PAD]

    # fc1 + relu   (dropout(0.2) -> identity in eval/inference mode)
    h = jnp.dot(x_ref[...].astype(jnp.bfloat16),
                wb_ref[pl.ds(_W1_OFF, STATE_DIM), :],
                preferred_element_type=jnp.float32) + b1
    h = jnp.maximum(h, 0.0)

    # fc2 + relu
    h = jnp.dot(h.astype(jnp.bfloat16),
                wb_ref[pl.ds(_W2_OFF, HIDDEN_DIM), :],
                preferred_element_type=jnp.float32) + b2
    h = jnp.maximum(h, 0.0)

    # fc3 + relu
    h = jnp.dot(h.astype(jnp.bfloat16),
                wb_ref[pl.ds(_W3_OFF, HIDDEN_DIM), :],
                preferred_element_type=jnp.float32) + b3
    h = jnp.maximum(h, 0.0)

    # fused actor+critic head: single (256,128) matmul -> lane-dense result.
    logits = jnp.dot(h.astype(jnp.bfloat16), wh_ref[...],
                     preferred_element_type=jnp.float32) + bh          # (TB, 128)

    lane = lax.broadcasted_iota(jnp.int32, logits.shape, 1)
    actor_lane = lane < ACTION_DIM
    # exclude the critic lane (25) and pad lanes (26..127) from the softmax
    masked = jnp.where(actor_lane, logits, NEG_BIG)
    m = jnp.max(masked, axis=-1, keepdims=True)
    e = jnp.exp(masked - m)                                            # pads -> 0
    # exact reciprocal: hidden under DMA/MXU, keeps sum(probs) == 1 to f32 eps
    inv = pl.reciprocal(jnp.sum(e, axis=-1, keepdims=True), approx=False)
    probs = e * inv

    # pack probs (lanes 0..24) and the raw critic value (lane 25) into one slab
    out_ref[...] = jnp.where(lane == ACTION_DIM, logits, probs).astype(out_ref.dtype)


def _choose_tile(batch):
    """Pick (tb, pad_b): tb a multiple of 8, pad_b a multiple of tb."""
    pad8 = max(8, -(-batch // 8) * 8)
    if pad8 <= 128:
        return pad8, pad8                      # tiny batch: single exact-size tile
    best = None
    for tb in (128, 256, 512, 1024):
        padded = -(-pad8 // tb) * tb
        steps = padded // tb
        waste = padded - batch
        # minimal padding waste first; among ties prefer >=2 grid steps with a
        # big-enough tile (keeps both v7x TensorCores busy while amortizing the
        # ~0.35us per-step cost), then the largest tile.
        key = (waste, 0 if (steps >= 2 and tb >= 256) else 1, -tb)
        if best is None or key < best[0]:
            best = (key, tb, padded)
    return best[1], best[2]


def _policy_call(x_pad, w_body, w_head, b_packed, tb, out_dtype,
                 single_buffer_weights):
    pad_b = x_pad.shape[0]

    def const_spec(shape):
        # Weights/biases: constant index_map -> fetched once, VMEM-resident.
        if single_buffer_weights:
            return pl.BlockSpec(shape, lambda i: (0, 0),
                                pipeline_mode=pl.Buffered(1))
        return pl.BlockSpec(shape, lambda i: (0, 0))

    w_bytes = (w_body.size * w_body.dtype.itemsize
               + w_head.size * w_head.dtype.itemsize
               + b_packed.size * b_packed.dtype.itemsize)
    out_itemsize = jnp.dtype(out_dtype).itemsize
    cost = pl.CostEstimate(
        flops=2 * pad_b * (STATE_DIM * HIDDEN_DIM
                           + 2 * HIDDEN_DIM * HIDDEN_DIM
                           + HIDDEN_DIM * HEAD_PAD),
        transcendentals=pad_b * HEAD_PAD,
        bytes_accessed=w_bytes + pad_b * (STATE_DIM * x_pad.dtype.itemsize
                                          + HEAD_PAD * out_itemsize),
    )

    return pl.pallas_call(
        _policy_kernel,
        out_shape=jax.ShapeDtypeStruct((pad_b, HEAD_PAD), out_dtype),
        grid_spec=pltpu.PrefetchScalarGridSpec(
            num_scalar_prefetch=0,
            grid=(pad_b // tb,),
            in_specs=[
                pl.BlockSpec((tb, STATE_DIM), lambda i: (i, 0)),
                const_spec(w_body.shape),
                const_spec(w_head.shape),
                const_spec(b_packed.shape),
            ],
            out_specs=pl.BlockSpec((tb, HEAD_PAD), lambda i: (i, 0)),
        ),
        compiler_params=pltpu.CompilerParams(
            dimension_semantics=("parallel",)),
        cost_estimate=cost,
    )(x_pad, w_body, w_head, b_packed)


def policy_forward(x, w_body, w_head, b_packed, *, out_dtype=jnp.float32):
    """Full forward pass. Returns (action_probs (B,25), state_value (B,1)).

    out_dtype=jnp.bfloat16 halves the HBM write stream (mem-bound v6e/v7x
    large-batch regime) at the cost of ~3 significant digits on probs/value.
    """
    B = x.shape[0]
    tb, pad_b = _choose_tile(B)
    if pad_b != B:
        x = jnp.pad(x, ((0, pad_b - B), (0, 0)))
    try:
        out = _policy_call(x, w_body, w_head, b_packed, tb, out_dtype, True)
    except Exception:
        # pl.Buffered(1) single-buffering not supported on this jax build;
        # fall back to default double-buffered (still fetched only once).
        out = _policy_call(x, w_body, w_head, b_packed, tb, out_dtype, False)

    probs = out[:B, :ACTION_DIM]
    value = out[:B, ACTION_DIM:ACTION_DIM + 1]
    return probs, value


def init_params(key):
    """f32 master params mimicking nn.Linear default init. W is (in, out)."""
    def linear(k, fan_in, fan_out):
        kw, kb = jax.random.split(k)
        bound = 1.0 / math.sqrt(fan_in)
        w = jax.random.uniform(kw, (fan_in, fan_out), jnp.float32, -bound, bound)
        b = jax.random.uniform(kb, (1, fan_out), jnp.float32, -bound, bound)
        return w, b

    k1, k2, k3, ka, kc = jax.random.split(key, 5)
    w1, b1 = linear(k1, STATE_DIM, HIDDEN_DIM)
    w2, b2 = linear(k2, HIDDEN_DIM, HIDDEN_DIM)
    w3, b3 = linear(k3, HIDDEN_DIM, HIDDEN_DIM)
    wa, ba = linear(ka, HIDDEN_DIM, ACTION_DIM)
    wc, bc = linear(kc, HIDDEN_DIM, 1)
    return dict(w1=w1, b1=b1, w2=w2, b2=b2, w3=w3, b3=b3,
                wa=wa, ba=ba, wc=wc, bc=bc)


def pack_params(p):
    """Pack body weights into one bf16 (640,256) slab, the fused actor+critic
    head into a bf16 (256,128) slab, and all biases into one f32 (8,256) slab."""
    w_body = jnp.concatenate([p["w1"], p["w2"], p["w3"]],
                             axis=0).astype(jnp.bfloat16)
    assert w_body.shape == (_WB_ROWS, HIDDEN_DIM)

    w_head = jnp.zeros((HIDDEN_DIM, HEAD_PAD), jnp.float32)
    w_head = w_head.at[:, :ACTION_DIM].set(p["wa"])
    w_head = w_head.at[:, ACTION_DIM:ACTION_DIM + 1].set(p["wc"])
    w_head = w_head.astype(jnp.bfloat16)

    b_packed = jnp.zeros((8, HIDDEN_DIM), jnp.float32)
    b_packed = b_packed.at[0:1].set(p["b1"])
    b_packed = b_packed.at[1:2].set(p["b2"])
    b_packed = b_packed.at[2:3].set(p["b3"])
    b_packed = b_packed.at[3, :ACTION_DIM].set(p["ba"][0])
    b_packed = b_packed.at[3, ACTION_DIM].set(p["bc"][0, 0])
    return w_body, w_head, b_packed


def reference_forward(x, p, matmul_dtype=jnp.float32):
    """Pure-JAX reference. matmul_dtype=bf16 mirrors the kernel's MXU numerics."""
    def mm(a, w):
        return jnp.dot(a.astype(matmul_dtype), w.astype(matmul_dtype),
                       preferred_element_type=jnp.float32)
    h = jnp.maximum(mm(x, p["w1"]) + p["b1"], 0.0)
    h = jnp.maximum(mm(h, p["w2"]) + p["b2"], 0.0)
    h = jnp.maximum(mm(h, p["w3"]) + p["b3"], 0.0)
    probs = jax.nn.softmax(mm(h, p["wa"]) + p["ba"], axis=-1)
    value = mm(h, p["wc"]) + p["bc"]
    return probs, value


if __name__ == "__main__":
    key = jax.random.PRNGKey(0)
    k_params, k_state = jax.random.split(key)

    params = init_params(k_params)
    w_body, w_head, b_packed = pack_params(params)

    batch = 8
    state = jax.random.normal(k_state, (batch, STATE_DIM), jnp.float32)

    probs, value = policy_forward(state, w_body, w_head, b_packed)
    jax.block_until_ready((probs, value))

    assert probs.shape == (batch, ACTION_DIM)
    assert value.shape == (batch, 1)

    # numerics-matched reference (bf16 MXU operands, f32 accumulation)
    ref_probs, ref_value = reference_forward(state, params, jnp.bfloat16)
    assert jnp.allclose(probs, ref_probs, atol=1e-2, rtol=1e-2)
    assert jnp.allclose(value, ref_value, atol=1e-2, rtol=1e-2)

    # loose check against the pure-f32 module semantics
    f32_probs, f32_value = reference_forward(state, params, jnp.float32)
    assert jnp.allclose(probs, f32_probs, atol=5e-2, rtol=5e-2)
    assert jnp.allclose(value, f32_value, atol=5e-2, rtol=5e-2)

    assert jnp.allclose(jnp.sum(probs, axis=-1), 1.0, atol=1e-3)

    # exercise the adaptive-tile / padded-batch path (B not a multiple of 8)
    state2 = jax.random.normal(jax.random.PRNGKey(1), (200, STATE_DIM),
                               jnp.float32)
    probs2, value2 = policy_forward(state2, w_body, w_head, b_packed)
    jax.block_until_ready((probs2, value2))
    assert probs2.shape == (200, ACTION_DIM) and value2.shape == (200, 1)
    assert jnp.allclose(jnp.sum(probs2, axis=-1), 1.0, atol=1e-3)

    print("KERNEL_OK")
</pallas_src>

<mosaic_0001>
module attributes {stable_mosaic.version = 11 : i64} {
  func.func @_policy_kernel(%arg0: i32, %arg1: memref<8x128xf32, #tpu.memory_space<vmem>>, %arg2: memref<640x256xbf16, #tpu.memory_space<vmem>>, %arg3: memref<256x128xbf16, #tpu.memory_space<vmem>>, %arg4: memref<8x256xf32, #tpu.memory_space<vmem>>, %arg5: memref<8x128xf32, #tpu.memory_space<vmem>>) attributes {dimension_semantics = [#tpu.dimension_semantics<parallel>], iteration_bounds = array<i64: 1>, scalar_prefetch = 0 : i64, scratch_operands = 0 : i64, tpu.core_type = #tpu.core_type<tc>, window_params = [{transform_indices = @transform_0, window_bounds = array<i64: 8, 128>}, {pipeline_mode = #tpu.pipeline_mode<synchronous>, transform_indices = @transform_1, window_bounds = array<i64: 640, 256>}, {pipeline_mode = #tpu.pipeline_mode<synchronous>, transform_indices = @transform_2, window_bounds = array<i64: 256, 128>}, {pipeline_mode = #tpu.pipeline_mode<synchronous>, transform_indices = @transform_3, window_bounds = array<i64: 8, 256>}, {transform_indices = @transform_4, window_bounds = array<i64: 8, 128>}]} {
    %c0 = arith.constant 0 : index
    %c0_0 = arith.constant 0 : index
    %0 = vector.load %arg4[%c0, %c0_0] : memref<8x256xf32, #tpu.memory_space<vmem>>, vector<8x256xf32>
    %1 = vector.extract_strided_slice %0 {offsets = [0, 0], sizes = [1, 256], strides = [1, 1]} : vector<8x256xf32> to vector<1x256xf32>
    %2 = vector.extract_strided_slice %0 {offsets = [1, 0], sizes = [1, 256], strides = [1, 1]} : vector<8x256xf32> to vector<1x256xf32>
    %3 = vector.extract_strided_slice %0 {offsets = [2, 0], sizes = [1, 256], strides = [1, 1]} : vector<8x256xf32> to vector<1x256xf32>
    %4 = vector.extract_strided_slice %0 {offsets = [3, 0], sizes = [1, 128], strides = [1, 1]} : vector<8x256xf32> to vector<1x128xf32>
    %c0_1 = arith.constant 0 : index
    %c0_2 = arith.constant 0 : index
    %5 = vector.load %arg1[%c0_1, %c0_2] : memref<8x128xf32, #tpu.memory_space<vmem>>, vector<8x128xf32>
    %6 = arith.truncf %5 : vector<8x128xf32> to vector<8x128xbf16>
    %c0_3 = arith.constant 0 : index
    %c0_4 = arith.constant 0 : index
    %7 = vector.load %arg2[%c0_3, %c0_4] : memref<640x256xbf16, #tpu.memory_space<vmem>>, vector<128x256xbf16>
    %cst = arith.constant dense<0.000000e+00> : vector<8x256xf32>
    %8 = tpu.matmul %6, %7, %cst {dimension_numbers = #tpu.dot_dimension_numbers<[1], [0], [0], [1], [0, 0, 1, 1], [], []>} : vector<8x128xbf16>, vector<128x256xbf16>, vector<8x256xf32> -> vector<8x256xf32>
    %9 = vector.broadcast %1 : vector<1x256xf32> to vector<8x256xf32>
    %10 = arith.addf %8, %9 : vector<8x256xf32>
    %cst_5 = arith.constant 0.000000e+00 : f32
    %11 = vector.broadcast %cst_5 : f32 to vector<8x256xf32>
    %12 = arith.maximumf %10, %11 : vector<8x256xf32>
    %13 = arith.truncf %12 : vector<8x256xf32> to vector<8x256xbf16>
    %c128 = arith.constant 128 : index
    %c0_6 = arith.constant 0 : index
    %14 = vector.load %arg2[%c128, %c0_6] : memref<640x256xbf16, #tpu.memory_space<vmem>>, vector<256x256xbf16>
    %cst_7 = arith.constant dense<0.000000e+00> : vector<8x256xf32>
    %15 = tpu.matmul %13, %14, %cst_7 {dimension_numbers = #tpu.dot_dimension_numbers<[1], [0], [0], [1], [0, 0, 1, 1], [], []>} : vector<8x256xbf16>, vector<256x256xbf16>, vector<8x256xf32> -> vector<8x256xf32>
    %16 = vector.broadcast %2 : vector<1x256xf32> to vector<8x256xf32>
    %17 = arith.addf %15, %16 : vector<8x256xf32>
    %cst_8 = arith.constant 0.000000e+00 : f32
    %18 = vector.broadcast %cst_8 : f32 to vector<8x256xf32>
    %19 = arith.maximumf %17, %18 : vector<8x256xf32>
    %20 = arith.truncf %19 : vector<8x256xf32> to vector<8x256xbf16>
    %c384 = arith.constant 384 : index
    %c0_9 = arith.constant 0 : index
    %21 = vector.load %arg2[%c384, %c0_9] : memref<640x256xbf16, #tpu.memory_space<vmem>>, vector<256x256xbf16>
    %cst_10 = arith.constant dense<0.000000e+00> : vector<8x256xf32>
    %22 = tpu.matmul %20, %21, %cst_10 {dimension_numbers = #tpu.dot_dimension_numbers<[1], [0], [0], [1], [0, 0, 1, 1], [], []>} : vector<8x256xbf16>, vector<256x256xbf16>, vector<8x256xf32> -> vector<8x256xf32>
    %23 = vector.broadcast %3 : vector<1x256xf32> to vector<8x256xf32>
    %24 = arith.addf %22, %23 : vector<8x256xf32>
    %cst_11 = arith.constant 0.000000e+00 : f32
    %25 = vector.broadcast %cst_11 : f32 to vector<8x256xf32>
    %26 = arith.maximumf %24, %25 : vector<8x256xf32>
    %27 = arith.truncf %26 : vector<8x256xf32> to vector<8x256xbf16>
    %c0_12 = arith.constant 0 : index
    %c0_13 = arith.constant 0 : index
    %28 = vector.load %arg3[%c0_12, %c0_13] : memref<256x128xbf16, #tpu.memory_space<vmem>>, vector<256x128xbf16>
    %cst_14 = arith.constant dense<0.000000e+00> : vector<8x128xf32>
    %29 = tpu.matmul %27, %28, %cst_14 {dimension_numbers = #tpu.dot_dimension_numbers<[1], [0], [0], [1], [0, 0, 1, 1], [], []>} : vector<8x256xbf16>, vector<256x128xbf16>, vector<8x128xf32> -> vector<8x128xf32>
    %30 = vector.broadcast %4 : vector<1x128xf32> to vector<8x128xf32>
    %31 = arith.addf %29, %30 : vector<8x128xf32>
    %32 = tpu.iota {dimensions = array<i32: 1>} : vector<8x128xi32>
    %c25_i32 = arith.constant 25 : i32
    %33 = vector.broadcast %c25_i32 : i32 to vector<8x128xi32>
    %34 = arith.cmpi slt, %32, %33 : vector<8x128xi32>
    %cst_15 = arith.constant -1.000000e+30 : f32
    %35 = vector.broadcast %cst_15 : f32 to vector<8x128xf32>
    %36 = arith.select %34, %31, %35 : vector<8x128xi1>, vector<8x128xf32>
    %cst_16 = arith.constant dense<0xFF800000> : vector<8xf32>
    %37 = vector.multi_reduction <maximumf>, %36, %cst_16 [1] : vector<8x128xf32> to vector<8xf32>
    %38 = vector.shape_cast %37 : vector<8xf32> to vector<8x1xf32>
    %39 = vector.broadcast %38 : vector<8x1xf32> to vector<8x128xf32>
    %40 = arith.subf %36, %39 : vector<8x128xf32>
    %41 = math.exp %40 : vector<8x128xf32>
    %cst_17 = arith.constant dense<0.000000e+00> : vector<8xf32>
    %42 = vector.multi_reduction <add>, %41, %cst_17 [1] : vector<8x128xf32> to vector<8xf32>
    %43 = vector.shape_cast %42 : vector<8xf32> to vector<8x1xf32>
    %44 = tpu.reciprocal %43 : vector<8x1xf32> -> vector<8x1xf32>
    %45 = vector.broadcast %44 : vector<8x1xf32> to vector<8x128xf32>
    %46 = arith.mulf %41, %45 : vector<8x128xf32>
    %c25_i32_18 = arith.constant 25 : i32
    %47 = vector.broadcast %c25_i32_18 : i32 to vector<8x128xi32>
    %48 = arith.cmpi eq, %32, %47 : vector<8x128xi32>
    %49 = arith.select %48, %31, %46 : vector<8x128xi1>, vector<8x128xf32>
    %c0_19 = arith.constant 0 : index
    %c0_20 = arith.constant 0 : index
    %50 = vector.load %arg5[%c0_19, %c0_20] : memref<8x128xf32, #tpu.memory_space<vmem>>, vector<8x128xf32>
    tpu.vector_store %arg5[%c0_19, %c0_20], %49 {strides = array<i32>} : memref<8x128xf32, #tpu.memory_space<vmem>>, vector<8x128xf32>,
    return
  }
  func.func @transform_0(%arg0: i32) -> (i32, i32) {
    %c0_i32 = arith.constant 0 : i32
    %c0_i32_0 = arith.constant 0 : i32
    return %arg0, %c0_i32 : i32, i32
  }
  func.func @transform_1(%arg0: i32) -> (i32, i32) {
    %c0_i32 = arith.constant 0 : i32
    %c0_i32_0 = arith.constant 0 : i32
    %c0_i32_1 = arith.constant 0 : i32
    return %c0_i32, %c0_i32_0 : i32, i32
  }
  func.func @transform_2(%arg0: i32) -> (i32, i32) {
    %c0_i32 = arith.constant 0 : i32
    %c0_i32_0 = arith.constant 0 : i32
    %c0_i32_1 = arith.constant 0 : i32
    return %c0_i32, %c0_i32_0 : i32, i32
  }
  func.func @transform_3(%arg0: i32) -> (i32, i32) {
    %c0_i32 = arith.constant 0 : i32
    %c0_i32_0 = arith.constant 0 : i32
    %c0_i32_1 = arith.constant 0 : i32
    return %c0_i32, %c0_i32_0 : i32, i32
  }
  func.func @transform_4(%arg0: i32) -> (i32, i32) {
    %c0_i32 = arith.constant 0 : i32
    %c0_i32_0 = arith.constant 0 : i32
    return %arg0, %c0_i32 : i32, i32
  }
}

module attributes {stable_mosaic.version = 11 : i64} {
  func.func @_policy_kernel(%arg0: i32, %arg1: memref<8x128xf32, #tpu.memory_space<vmem>>, %arg2: memref<640x256xbf16, #tpu.memory_space<vmem>>, %arg3: memref<256x128xbf16, #tpu.memory_space<vmem>>, %arg4: memref<8x256xf32, #tpu.memory_space<vmem>>, %arg5: memref<8x128xf32, #tpu.memory_space<vmem>>) attributes {dimension_semantics = [#tpu.dimension_semantics<parallel>], iteration_bounds = array<i64: 1>, scalar_prefetch = 0 : i64, scratch_operands = 0 : i64, tpu.core_type = #tpu.core_type<tc>, window_params = [{transform_indices = @transform_0, window_bounds = array<i64: 8, 128>}, {pipeline_mode = #tpu.pipeline_mode<synchronous>, transform_indices = @transform_1, window_bounds = array<i64: 640, 256>}, {pipeline_mode = #tpu.pipeline_mode<synchronous>, transform_indices = @transform_2, window_bounds = array<i64: 256, 128>}, {pipeline_mode = #tpu.pipeline_mode<synchronous>, transform_indices = @transform_3, window_bounds = array<i64: 8, 256>}, {transform_indices = @transform_4, window_bounds = array<i64: 8, 128>}]} {
    %c0 = arith.constant 0 : index
    %c0_0 = arith.constant 0 : index
    %0 = vector.load %arg4[%c0, %c0_0] : memref<8x256xf32, #tpu.memory_space<vmem>>, vector<8x256xf32>
    %1 = vector.extract_strided_slice %0 {offsets = [0, 0], sizes = [1, 256], strides = [1, 1]} : vector<8x256xf32> to vector<1x256xf32>
    %2 = vector.extract_strided_slice %0 {offsets = [1, 0], sizes = [1, 256], strides = [1, 1]} : vector<8x256xf32> to vector<1x256xf32>
    %3 = vector.extract_strided_slice %0 {offsets = [2, 0], sizes = [1, 256], strides = [1, 1]} : vector<8x256xf32> to vector<1x256xf32>
    %4 = vector.extract_strided_slice %0 {offsets = [3, 0], sizes = [1, 128], strides = [1, 1]} : vector<8x256xf32> to vector<1x128xf32>
    %c0_1 = arith.constant 0 : index
    %c0_2 = arith.constant 0 : index
    %5 = vector.load %arg1[%c0_1, %c0_2] : memref<8x128xf32, #tpu.memory_space<vmem>>, vector<8x128xf32>
    %6 = arith.truncf %5 : vector<8x128xf32> to vector<8x128xbf16>
    %c0_3 = arith.constant 0 : index
    %c0_4 = arith.constant 0 : index
    %7 = vector.load %arg2[%c0_3, %c0_4] : memref<640x256xbf16, #tpu.memory_space<vmem>>, vector<128x256xbf16>
    %cst = arith.constant dense<0.000000e+00> : vector<8x256xf32>
    %8 = tpu.matmul %6, %7, %cst {dimension_numbers = #tpu.dot_dimension_numbers<[1], [0], [0], [1], [0, 0, 1, 1], [], []>} : vector<8x128xbf16>, vector<128x256xbf16>, vector<8x256xf32> -> vector<8x256xf32>
    %9 = vector.broadcast %1 : vector<1x256xf32> to vector<8x256xf32>
    %10 = arith.addf %8, %9 : vector<8x256xf32>
    %cst_5 = arith.constant 0.000000e+00 : f32
    %11 = vector.broadcast %cst_5 : f32 to vector<8x256xf32>
    %12 = arith.maximumf %10, %11 : vector<8x256xf32>
    %13 = arith.truncf %12 : vector<8x256xf32> to vector<8x256xbf16>
    %c128 = arith.constant 128 : index
    %c0_6 = arith.constant 0 : index
    %14 = vector.load %arg2[%c128, %c0_6] : memref<640x256xbf16, #tpu.memory_space<vmem>>, vector<256x256xbf16>
    %cst_7 = arith.constant dense<0.000000e+00> : vector<8x256xf32>
    %15 = tpu.matmul %13, %14, %cst_7 {dimension_numbers = #tpu.dot_dimension_numbers<[1], [0], [0], [1], [0, 0, 1, 1], [], []>} : vector<8x256xbf16>, vector<256x256xbf16>, vector<8x256xf32> -> vector<8x256xf32>
    %16 = vector.broadcast %2 : vector<1x256xf32> to vector<8x256xf32>
    %17 = arith.addf %15, %16 : vector<8x256xf32>
    %cst_8 = arith.constant 0.000000e+00 : f32
    %18 = vector.broadcast %cst_8 : f32 to vector<8x256xf32>
    %19 = arith.maximumf %17, %18 : vector<8x256xf32>
    %20 = arith.truncf %19 : vector<8x256xf32> to vector<8x256xbf16>
    %c384 = arith.constant 384 : index
    %c0_9 = arith.constant 0 : index
    %21 = vector.load %arg2[%c384, %c0_9] : memref<640x256xbf16, #tpu.memory_space<vmem>>, vector<256x256xbf16>
    %cst_10 = arith.constant dense<0.000000e+00> : vector<8x256xf32>
    %22 = tpu.matmul %20, %21, %cst_10 {dimension_numbers = #tpu.dot_dimension_numbers<[1], [0], [0], [1], [0, 0, 1, 1], [], []>} : vector<8x256xbf16>, vector<256x256xbf16>, vector<8x256xf32> -> vector<8x256xf32>
    %23 = vector.broadcast %3 : vector<1x256xf32> to vector<8x256xf32>
    %24 = arith.addf %22, %23 : vector<8x256xf32>
    %cst_11 = arith.constant 0.000000e+00 : f32
    %25 = vector.broadcast %cst_11 : f32 to vector<8x256xf32>
    %26 = arith.maximumf %24, %25 : vector<8x256xf32>
    %27 = arith.truncf %26 : vector<8x256xf32> to vector<8x256xbf16>
    %c0_12 = arith.constant 0 : index
    %c0_13 = arith.constant 0 : index
    %28 = vector.load %arg3[%c0_12, %c0_13] : memref<256x128xbf16, #tpu.memory_space<vmem>>, vector<256x128xbf16>
    %cst_14 = arith.constant dense<0.000000e+00> : vector<8x128xf32>
    %29 = tpu.matmul %27, %28, %cst_14 {dimension_numbers = #tpu.dot_dimension_numbers<[1], [0], [0], [1], [0, 0, 1, 1], [], []>} : vector<8x256xbf16>, vector<256x128xbf16>, vector<8x128xf32> -> vector<8x128xf32>
    %30 = vector.broadcast %4 : vector<1x128xf32> to vector<8x128xf32>
    %31 = arith.addf %29, %30 : vector<8x128xf32>
    %32 = tpu.iota {dimensions = array<i32: 1>} : vector<8x128xi32>
    %c25_i32 = arith.constant 25 : i32
    %33 = vector.broadcast %c25_i32 : i32 to vector<8x128xi32>
    %34 = arith.cmpi slt, %32, %33 : vector<8x128xi32>
    %cst_15 = arith.constant -1.000000e+30 : f32
    %35 = vector.broadcast %cst_15 : f32 to vector<8x128xf32>
    %36 = arith.select %34, %31, %35 : vector<8x128xi1>, vector<8x128xf32>
    %cst_16 = arith.constant dense<0xFF800000> : vector<8xf32>
    %37 = vector.multi_reduction <maximumf>, %36, %cst_16 [1] : vector<8x128xf32> to vector<8xf32>
    %38 = vector.shape_cast %37 : vector<8xf32> to vector<8x1xf32>
    %39 = vector.broadcast %38 : vector<8x1xf32> to vector<8x128xf32>
    %40 = arith.subf %36, %39 : vector<8x128xf32>
    %41 = math.exp %40 : vector<8x128xf32>
    %cst_17 = arith.constant dense<0.000000e+00> : vector<8xf32>
    %42 = vector.multi_reduction <add>, %41, %cst_17 [1] : vector<8x128xf32> to vector<8xf32>
    %43 = vector.shape_cast %42 : vector<8xf32> to vector<8x1xf32>
    %44 = tpu.reciprocal %43 : vector<8x1xf32> -> vector<8x1xf32>
    %45 = vector.broadcast %44 : vector<8x1xf32> to vector<8x128xf32>
    %46 = arith.mulf %41, %45 : vector<8x128xf32>
    %c25_i32_18 = arith.constant 25 : i32
    %47 = vector.broadcast %c25_i32_18 : i32 to vector<8x128xi32>
    %48 = arith.cmpi eq, %32, %47 : vector<8x128xi32>
    %49 = arith.select %48, %31, %46 : vector<8x128xi1>, vector<8x128xf32>
    %c0_19 = arith.constant 0 : index
    %c0_20 = arith.constant 0 : index
    %50 = vector.load %arg5[%c0_19, %c0_20] : memref<8x128xf32, #tpu.memory_space<vmem>>, vector<8x128xf32>
    tpu.vector_store %arg5[%c0_19, %c0_20], %49 {strides = array<i32>} : memref<8x128xf32, #tpu.memory_space<vmem>>, vector<8x128xf32>,
    return
  }
  func.func @transform_0(%arg0: i32) -> (i32, i32) {
    %c0_i32 = arith.constant 0 : i32
    %c0_i32_0 = arith.constant 0 : i32
    return %arg0, %c0_i32 : i32, i32
  }
  func.func @transform_1(%arg0: i32) -> (i32, i32) {
    %c0_i32 = arith.constant 0 : i32
    %c0_i32_0 = arith.constant 0 : i32
    %c0_i32_1 = arith.constant 0 : i32
    return %c0_i32, %c0_i32_0 : i32, i32
  }
  func.func @transform_2(%arg0: i32) -> (i32, i32) {
    %c0_i32 = arith.constant 0 : i32
    %c0_i32_0 = arith.constant 0 : i32
    %c0_i32_1 = arith.constant 0 : i32
    return %c0_i32, %c0_i32_0 : i32, i32
  }
  func.func @transform_3(%arg0: i32) -> (i32, i32) {
    %c0_i32 = arith.constant 0 : i32
    %c0_i32_0 = arith.constant 0 : i32
    %c0_i32_1 = arith.constant 0 : i32
    return %c0_i32, %c0_i32_0 : i32, i32
  }
  func.func @transform_4(%arg0: i32) -> (i32, i32) {
    %c0_i32 = arith.constant 0 : i32
    %c0_i32_0 = arith.constant 0 : i32
    return %arg0, %c0_i32 : i32, i32
  }
}

</mosaic_0001>

<bundles_post_ra>
// kernel: tpu_custom_call.1
= control target key start
LH: loop header
LB: loop body
LE: loop exit
PB: predicated region body
PF: predicated region fallthrough
CT: control target
= control target key end

     0   :  { %9 = vsyncpa [#allocation3], 0  ;;  %s1593_s0 = inlined_call_operand.hbm [shape: f32[8,128], index: 0, kind: input, shape index: {}]   ;;  %s1594_s1 = inlined_call_operand.hbm [shape: bf16[640,256], index: 1, kind: input, shape index: {}]   ;;  %s1595_s2 = inlined_call_operand.hbm [shape: bf16[256,128], index: 2, kind: input, shape index: {}]   ;;  %s1596_s3 = inlined_call_operand.hbm [shape: f32[8,256], index: 3, kind: input, shape index: {}]   ;;  %s1597_s4 = inlined_call_operand.hbm [shape: f32[8,128], index: 4, kind: output, shape index: {}]  }
   0x1   :  { %10 = vsyncpa [#allocation6], 0 }
   0x2   :  { %11 = vsyncpa [#allocation9], 0  ;;  %s28_s17 = sshll.u32 %s1594_s1, 4  ;;  %s29_s17 = int_to_ptr.hbm [resolvable:$true] %s28_s17 }
   0x3   :  { %12 = vsyncpa [#allocation4], 0  ;;  %s1533_s18 = smov [#allocation5]   ;;  %s18_s22 = sshll.u32 %s1593_s0, 4  ;;  %s19_s22 = int_to_ptr.hbm [resolvable:$true] %s18_s22 }
   0x4   :  { %s30_s19 = sshll.u32 %s1533_s18, 4  ;;  %s1534_s23 = smov 128   ;;  %s31_s19 = int_to_ptr.vmem [resolvable:$true] %s30_s19 }
   0x5   :  { %s1535_s24 = smov 8   ;;  %s1536_s25 = smov [#allocation2]  }
   0x6   :  { %36 = dma.hbm_to_vmem [thread:$0]  %s29_s17, 10240, %s31_s19, [#allocation6], %s1534_s23, %s1534_s23, %s1535_s24  }
   0x7   :  { %s20_s26 = sshll.u32 %s1536_s25, 4  ;;  %s41_s29 = sshll.u32 %s1595_s2, 4  ;;  %s21_s26 = int_to_ptr.vmem [resolvable:$true] %s20_s26  ;;  %s42_s29 = int_to_ptr.hbm [resolvable:$true] %s41_s29 }
   0x8   :  { %23 = dma.hbm_to_vmem [thread:$0]  %s19_s22, 128, %s21_s26, [#allocation3]  }
   0x9   :  { %s1537_s1 = smov [#allocation7]   ;;  %s55_s0 = sshll.u32 %s1596_s3, 4  ;;  %s56_s0 = int_to_ptr.hbm [resolvable:$true] %s55_s0 }
   0xa   :  { %s43_s30 = sshll.u32 %s1537_s1, 4  ;;  %s1538_s7 = smov 64   ;;  %s44_s30 = int_to_ptr.vmem [resolvable:$true] %s43_s30 }
   0xb   :  { %s1539_s8 = smov 4   ;;  %s1540_s9 = smov [#allocation8]  }
   0xc   :  { %49 = dma.hbm_to_vmem [thread:$0]  %s42_s29, 2048, %s44_s30, [#allocation6], %s1538_s7, %s1538_s7, %s1539_s8  }
   0xd   :  { %s57_s10 = sshll.u32 %s1540_s9, 4  ;;  %s58_s10 = int_to_ptr.vmem [resolvable:$true] %s57_s10 }
   0xe   :  { %60 = dma.hbm_to_vmem [thread:$0]  %s56_s0, 256, %s58_s10, [#allocation9]  }
   0xf   :  { %1525 = dma.done.wait [#allocation3], 128  }
  0x10   :  { %1526 = vsyncadd [#allocation3], 4294967168 }
  0x11   :  { %1527 = dma.done.wait [#allocation6], 12288  }
  0x12   :  { %1528 = vsyncadd [#allocation6], 4294955008 }
  0x13   :  { %1529 = dma.done.wait [#allocation9], 256  }
  0x14   :  { %1530 = vsyncadd [#allocation9], 4294967040  ;;  %v970_v0 = vld [vmem:[#allocation5 + $0x70] sm:$0xf]  ;;  %v1311_v1 = vld [vmem:[#allocation5 + $0x74] sm:$0xf0] }
  0x15   :  { %v1310_v2 = vld [vmem:[#allocation5 + $0x74] sm:$0xf]  ;;  %v971_v3 = vor.u32 %v1311_v1, %v970_v0  ;;  %v972_v4 = vld [vmem:[#allocation5 + $0x78] sm:$0xf0]  ;;  %v962_v5 = vld [vmem:[#allocation5 + $0x60] sm:$0xf] }
  0x16   :  { %v1309_v6 = vld [vmem:[#allocation5 + $0x64] sm:$0xf0]  ;;  %v975_v7 = vor.u32 %v1310_v2, %v972_v4  ;;  %v1308_v8 = vld [vmem:[#allocation5 + $0x64] sm:$0xf]  ;;  %v964_v9 = vld [vmem:[#allocation5 + $0x68] sm:$0xf0] }
  0x17   :  { %179 = vmatpush.bf16.msra.mxu0 %v971_v3  ;;  %v963_v10 = vor.u32 %v1309_v6, %v962_v5  ;;  %v967_v11 = vor.u32 %v1308_v8, %v964_v9  ;;  %v954_v12 = vld [vmem:[#allocation5 + $0x50] sm:$0xf]  ;;  %v1307_v13 = vld [vmem:[#allocation5 + $0x54] sm:$0xf0]  ;;  %v1306_v14 = vld [vmem:[#allocation5 + $0x54] sm:$0xf] }
  0x18   :  { %192 = vmatpush.bf16.msra.mxu1 %v975_v7  ;;  %v956_v15 = vld [vmem:[#allocation5 + $0x58] sm:$0xf0]  ;;  %v955_v16 = vor.u32 %v1307_v13, %v954_v12  ;;  %v946_v18 = vld [vmem:[#allocation5 + $0x40] sm:$0xf]  ;;  %v1305_v19 = vld [vmem:[#allocation5 + $0x44] sm:$0xf0] }
  0x19   :  { %v959_v17 = vor.u32 %v1306_v14, %v956_v15  ;;  %v1304_v20 = vld [vmem:[#allocation5 + $0x44] sm:$0xf]  ;;  %v948_v21 = vld [vmem:[#allocation5 + $0x48] sm:$0xf0]  ;;  %v947_v22 = vor.u32 %v1305_v19, %v946_v18  ;;  %v1034_v23 = vld [vmem:[#allocation5 + $0xf0] sm:$0xf] }
  0x1a   :  { %v1327_v24 = vld [vmem:[#allocation5 + $0xf4] sm:$0xf0]  ;;  %v1098_v25 = vld [vmem:[#allocation5 + $0x170] sm:$0xf]  ;;  %v951_v26 = vor.u32 %v1304_v20, %v948_v21  ;;  %v1302_v31 = vld [vmem:[#allocation5 + $0x34] sm:$0xf] }
  0x1b   :  { %180 = vmatpush.bf16.msra.mxu0 %v963_v10  ;;  %v938_v27 = vld [vmem:[#allocation5 + $0x30] sm:$0xf]  ;;  %v1303_v28 = vld [vmem:[#allocation5 + $0x34] sm:$0xf0]  ;;  %v1035_v29 = vor.u32 %v1327_v24, %v1034_v23  ;;  %v940_v32 = vld [vmem:[#allocation5 + $0x38] sm:$0xf0] }
  0x1c   :  { %193 = vmatpush.bf16.msra.mxu1 %v967_v11  ;;  %v1343_v30 = vld [vmem:[#allocation5 + $0x174] sm:$0xf0]  ;;  %v1026_v34 = vld [vmem:[#allocation5 + $0xe0] sm:$0xf]  ;;  %v1325_v35 = vld [vmem:[#allocation5 + $0xe4] sm:$0xf0]  ;;  %v939_v38 = vor.u32 %v1303_v28, %v938_v27  ;;  %v943_v43 = vor.u32 %v1302_v31, %v940_v32 }
  0x1d   :  { %v1099_v33 = vor.u32 %v1343_v30, %v1098_v25  ;;  %403 = vmatpush.bf16.msra.mxu2 %v1035_v29  ;;  %v1090_v36 = vld [vmem:[#allocation5 + $0x160] sm:$0xf]  ;;  %v1341_v37 = vld [vmem:[#allocation5 + $0x164] sm:$0xf0]  ;;  %v1027_v41 = vor.u32 %v1325_v35, %v1026_v34  ;;  %v1300_v44 = vld [vmem:[#allocation5 + $0x24] sm:$0xf] }
  0x1e   :  { %v930_v39 = vld [vmem:[#allocation5 + $0x20] sm:$0xf]  ;;  %v1301_v40 = vld [vmem:[#allocation5 + $0x24] sm:$0xf0]  ;;  %v1091_v42 = vor.u32 %v1341_v37, %v1090_v36  ;;  %v1018_v45 = vld [vmem:[#allocation5 + $0xd0] sm:$0xf] }
  0x1f   :  { %181 = vmatpush.bf16.msra.mxu0 %v955_v16  ;;  %416 = vmatpush.bf16.msra.mxu3 %v1099_v33  ;;  %v1323_v46 = vld [vmem:[#allocation5 + $0xd4] sm:$0xf0]  ;;  %v932_v47 = vld [vmem:[#allocation5 + $0x28] sm:$0xf0]  ;;  %v1082_v48 = vld [vmem:[#allocation5 + $0x150] sm:$0xf]  ;;  %v931_v51 = vor.u32 %v1301_v40, %v930_v39 }
  0x20   :  { %194 = vmatpush.bf16.msra.mxu1 %v959_v17  ;;  %v1339_v49 = vld [vmem:[#allocation5 + $0x154] sm:$0xf0]  ;;  %v1019_v50 = vor.u32 %v1323_v46, %v1018_v45  ;;  %v922_v52 = vld [vmem:[#allocation5 + $0x10] sm:$0xf]  ;;  %v1010_v54 = vld [vmem:[#allocation5 + $0xc0] sm:$0xf]  ;;  %v935_v56 = vor.u32 %v1300_v44, %v932_v47 }
  0x21   :  { %404 = vmatpush.bf16.msra.mxu2 %v1027_v41  ;;  %v1083_v53 = vor.u32 %v1339_v49, %v1082_v48  ;;  %v1321_v55 = vld [vmem:[#allocation5 + $0xc4] sm:$0xf0]  ;;  %v1299_v57 = vld [vmem:[#allocation5 + $0x14] sm:$0xf0]  ;;  %v1074_v58 = vld [vmem:[#allocation5 + $0x140] sm:$0xf] }
  0x22   :  { %v1337_v59 = vld [vmem:[#allocation5 + $0x144] sm:$0xf0]  ;;  %v1298_v60 = vld [vmem:[#allocation5 + $0x14] sm:$0xf]  ;;  %v924_v61 = vld [vmem:[#allocation5 + $0x18] sm:$0xf0]  ;;  %v1011_v63 = vor.u32 %v1321_v55, %v1010_v54  ;;  %v923_v0 = vor.u32 %v1299_v57, %v922_v52 }
  0x23   :  { %182 = vmatpush.bf16.msra.mxu0 %v947_v22  ;;  %417 = vmatpush.bf16.msra.mxu3 %v1091_v42  ;;  %v914_v62 = vld [vmem:[#allocation5] sm:$0xf]  ;;  %v1297_v1 = vld [vmem:[#allocation5 + $0x4] sm:$0xf0]  ;;  %v1075_v2 = vor.u32 %v1337_v59, %v1074_v58  ;;  %v1002_v3 = vld [vmem:[#allocation5 + $0xb0] sm:$0xf]  ;;  %v927_v5 = vor.u32 %v1298_v60, %v924_v61 }
  0x24   :  { %195 = vmatpush.bf16.msra.mxu1 %v951_v26  ;;  %v1319_v4 = vld [vmem:[#allocation5 + $0xb4] sm:$0xf0]  ;;  %v1296_v6 = vld [vmem:[#allocation5 + $0x4] sm:$0xf]  ;;  %v1066_v7 = vld [vmem:[#allocation5 + $0x130] sm:$0xf]  ;;  %v915_v15 = vor.u32 %v1297_v1, %v914_v62 }
  0x25   :  { %405 = vmatpush.bf16.msra.mxu2 %v1019_v50  ;;  %v1335_v8 = vld [vmem:[#allocation5 + $0x134] sm:$0xf0]  ;;  %v916_v9 = vld [vmem:[#allocation5 + $0x8] sm:$0xf0]  ;;  %v1326_v10 = vld [vmem:[#allocation5 + $0xf4] sm:$0xf]  ;;  %v1003_v14 = vor.u32 %v1319_v4, %v1002_v3 }
  0x26   :  { %v1036_v11 = vld [vmem:[#allocation5 + $0xf8] sm:$0xf0]  ;;  %v1342_v12 = vld [vmem:[#allocation5 + $0x174] sm:$0xf]  ;;  %v1067_v17 = vor.u32 %v1335_v8, %v1066_v7  ;;  %v994_v18 = vld [vmem:[#allocation5 + $0xa0] sm:$0xf]  ;;  %v919_v20 = vor.u32 %v1296_v6, %v916_v9 }
  0x27   :  { %183 = vmatpush.bf16.msra.mxu0 %v939_v38  ;;  %418 = vmatpush.bf16.msra.mxu3 %v1083_v53  ;;  %v1100_v13 = vld [vmem:[#allocation5 + $0x178] sm:$0xf0]  ;;  %v1317_v19 = vld [vmem:[#allocation5 + $0xa4] sm:$0xf0]  ;;  %v1039_v21 = vor.u32 %v1326_v10, %v1036_v11  ;;  %v1058_v22 = vld [vmem:[#allocation5 + $0x120] sm:$0xf] }
  0x28   :  { %196 = vmatpush.bf16.msra.mxu1 %v943_v43  ;;  %v79_v16 = vld [vmem:[#allocation2] sm:$0xff]  ;;  %v1333_v23 = vld [vmem:[#allocation5 + $0x124] sm:$0xf0]  ;;  %v1103_v24 = vor.u32 %v1342_v12, %v1100_v13  ;;  %v1324_v25 = vld [vmem:[#allocation5 + $0xe4] sm:$0xf]  ;;  %v995_v30 = vor.u32 %v1317_v19, %v994_v18  ;;  %s1541_s2 = smov [#allocation10]  }
  0x29   :  { %406 = vmatpush.bf16.msra.mxu2 %v1011_v63  ;;  %v1028_v26 = vld [vmem:[#allocation5 + $0xe8] sm:$0xf0]  ;;  %v80_v27 = vpack.c.bf16 %v79_v16, %v79_v16  ;;  %v1340_v28 = vld [vmem:[#allocation5 + $0x164] sm:$0xf]  ;;  %v1059_v31 = vor.u32 %v1333_v23, %v1058_v22  ;;  %v1322_v34 = vld [vmem:[#allocation5 + $0xd4] sm:$0xf] }
  0x2a   :  { %v1092_v29 = vld [vmem:[#allocation5 + $0x168] sm:$0xf0]  ;;  %v1031_v32 = vor.u32 %v1324_v25, %v1028_v26  ;;  %v1020_v35 = vld [vmem:[#allocation5 + $0xd8] sm:$0xf0]  ;;  %v1338_v36 = vld [vmem:[#allocation5 + $0x154] sm:$0xf] }
  0x2b   :  { %184 = vmatpush.bf16.msra.mxu0 %v931_v51  ;;  %419 = vmatpush.bf16.msra.mxu3 %v1075_v2  ;;  %v1095_v33 = vor.u32 %v1340_v28, %v1092_v29  ;;  %v1084_v37 = vld [vmem:[#allocation5 + $0x158] sm:$0xf0]  ;;  %v1023_v38 = vor.u32 %v1322_v34, %v1020_v35  ;;  %v1320_v40 = vld [vmem:[#allocation5 + $0xc4] sm:$0xf]  ;;  %v1012_v41 = vld [vmem:[#allocation5 + $0xc8] sm:$0xf0] }
  0x2c   :  { %197 = vmatpush.bf16.msra.mxu1 %v935_v56  ;;  %v1087_v39 = vor.u32 %v1338_v36, %v1084_v37  ;;  %v1336_v42 = vld [vmem:[#allocation5 + $0x144] sm:$0xf]  ;;  %v1076_v43 = vld [vmem:[#allocation5 + $0x148] sm:$0xf0]  ;;  %v1015_v44 = vor.u32 %v1320_v40, %v1012_v41  ;;  %v1318_v46 = vld [vmem:[#allocation5 + $0xb4] sm:$0xf] }
  0x2d   :  { %407 = vmatpush.bf16.msra.mxu2 %v1003_v14  ;;  %v1079_v45 = vor.u32 %v1336_v42, %v1076_v43  ;;  %v1004_v47 = vld [vmem:[#allocation5 + $0xb8] sm:$0xf0]  ;;  %v1334_v48 = vld [vmem:[#allocation5 + $0x134] sm:$0xf]  ;;  %v1316_v52 = vld [vmem:[#allocation5 + $0xa4] sm:$0xf] }
  0x2e   :  { %v1068_v49 = vld [vmem:[#allocation5 + $0x138] sm:$0xf0]  ;;  %v1007_v50 = vor.u32 %v1318_v46, %v1004_v47  ;;  %v996_v53 = vld [vmem:[#allocation5 + $0xa8] sm:$0xf0]  ;;  %v1332_v54 = vld [vmem:[#allocation5 + $0x124] sm:$0xf] }
  0x2f   :  { %185 = vmatpush.bf16.msra.mxu0 %v923_v0  ;;  %420 = vmatpush.bf16.msra.mxu3 %v1067_v17  ;;  %v1071_v51 = vor.u32 %v1334_v48, %v1068_v49  ;;  %v1060_v55 = vld [vmem:[#allocation5 + $0x128] sm:$0xf0]  ;;  %v999_v56 = vor.u32 %v1316_v52, %v996_v53  ;;  %v986_v58 = vld [vmem:[#allocation5 + $0x90] sm:$0xf]  ;;  %v1315_v59 = vld [vmem:[#allocation5 + $0x94] sm:$0xf0] }
  0x30   :  { %198 = vmatpush.bf16.msra.mxu1 %v927_v5  ;;  %v1063_v57 = vor.u32 %v1332_v54, %v1060_v55  ;;  %v1050_v60 = vld [vmem:[#allocation5 + $0x110] sm:$0xf]  ;;  %v987_v61 = vor.u32 %v1315_v59, %v986_v58  ;;  %v1331_v62 = vld [vmem:[#allocation5 + $0x114] sm:$0xf0]  ;;  %v1314_v63 = vld [vmem:[#allocation5 + $0x94] sm:$0xf] }
  0x31   :  { %408 = vmatpush.bf16.msra.mxu2 %v995_v30  ;;  %v1051_v0 = vor.u32 %v1331_v62, %v1050_v60  ;;  %v988_v1 = vld [vmem:[#allocation5 + $0x98] sm:$0xf0]  ;;  %v1330_v2 = vld [vmem:[#allocation5 + $0x114] sm:$0xf]  ;;  %v978_v6 = vld [vmem:[#allocation5 + $0x80] sm:$0xf] }
  0x32   :  { %v991_v3 = vor.u32 %v1314_v63, %v988_v1  ;;  %v1052_v4 = vld [vmem:[#allocation5 + $0x118] sm:$0xf0]  ;;  %v1313_v7 = vld [vmem:[#allocation5 + $0x84] sm:$0xf0]  ;;  %v1042_v8 = vld [vmem:[#allocation5 + $0x100] sm:$0xf] }
  0x33   :  { %186 = vmatpush.bf16.msra.mxu0 %v915_v15  ;;  %421 = vmatpush.bf16.msra.mxu3 %v1059_v31  ;;  %v1055_v5 = vor.u32 %v1330_v2, %v1052_v4  ;;  %v979_v9 = vor.u32 %v1313_v7, %v978_v6  ;;  %v1329_v10 = vld [vmem:[#allocation5 + $0x104] sm:$0xf0]  ;;  %v1312_v11 = vld [vmem:[#allocation5 + $0x84] sm:$0xf]  ;;  %v980_v12 = vld [vmem:[#allocation5 + $0x88] sm:$0xf0] }
  0x34   :  { %199 = vmatpush.bf16.msra.mxu1 %v919_v20  ;;  %v1043_v13 = vor.u32 %v1329_v10, %v1042_v8  ;;  %v983_v14 = vor.u32 %v1312_v11, %v980_v12  ;;  %v1328_v15 = vld [vmem:[#allocation5 + $0x104] sm:$0xf]  ;;  %v1044_v16 = vld [vmem:[#allocation5 + $0x108] sm:$0xf0]  ;;  %v1226_v18 = vld [vmem:[#allocation5 + $0x270] sm:$0xf] }
  0x35   :  { %409 = vmatpush.bf16.msra.mxu2 %v987_v61  ;;  %v1047_v17 = vor.u32 %v1328_v15, %v1044_v16  ;;  %v1375_v19 = vld [vmem:[#allocation5 + $0x274] sm:$0xf0]  ;;  %v1374_v20 = vld [vmem:[#allocation5 + $0x274] sm:$0xf]  ;;  %v1228_v22 = vld [vmem:[#allocation5 + $0x278] sm:$0xf0] }
  0x36   :  { %187 = vmatmul.bf16.vlgmr.msra.gmra.mxu0 %v80_v27  ;;  %v1218_v23 = vld [vmem:[#allocation5 + $0x260] sm:$0xf]  ;;  %v1231_v25 = vor.u32 %v1374_v20, %v1228_v22  ;;  %v1372_v26 = vld [vmem:[#allocation5 + $0x264] sm:$0xf]  ;;  %v1162_v28 = vld [vmem:[#allocation5 + $0x1f0] sm:$0xf] }
  0x37   :  { %429 = vmatpush.bf16.msrb.mxu0 %v1039_v21  ;;  %200 = vmatmul.bf16.vlgmr.msra.gmra.mxu1 %v80_v27  ;;  %v1227_v21 = vor.u32 %v1375_v19, %v1226_v18  ;;  %v1220_v27 = vld [vmem:[#allocation5 + $0x268] sm:$0xf0]  ;;  %v1359_v30 = vld [vmem:[#allocation5 + $0x1f4] sm:$0xf0]  ;;  %v1358_v31 = vld [vmem:[#allocation5 + $0x1f4] sm:$0xf] }
  0x38   :  { %442 = vmatpush.bf16.msrb.mxu1 %v1103_v24  ;;  %422 = vmatpush.bf16.msra.mxu3 %v1051_v0  ;;  %v1373_v24 = vld [vmem:[#allocation5 + $0x264] sm:$0xf0]  ;;  %v1163_v34 = vor.u32 %v1359_v30, %v1162_v28  ;;  %v1210_v36 = vld [vmem:[#allocation5 + $0x250] sm:$0xf]  ;;  %v1371_v37 = vld [vmem:[#allocation5 + $0x254] sm:$0xf0] }
  0x39   :  { %410 = vmatpush.bf16.msra.mxu2 %v979_v9  ;;  %v1219_v29 = vor.u32 %v1373_v24, %v1218_v23  ;;  %v1154_v40 = vld [vmem:[#allocation5 + $0x1e0] sm:$0xf]  ;;  %v1357_v41 = vld [vmem:[#allocation5 + $0x1e4] sm:$0xf0]  ;;  %v1356_v43 = vld [vmem:[#allocation5 + $0x1e4] sm:$0xf] }
  0x3a   :  { %v1155_v42 = vor.u32 %v1357_v41, %v1154_v40  ;;  %v1202_v47 = vld [vmem:[#allocation5 + $0x240] sm:$0xf]  ;;  %v1369_v48 = vld [vmem:[#allocation5 + $0x244] sm:$0xf0]  ;;  %v1354_v52 = vld [vmem:[#allocation5 + $0x1d4] sm:$0xf] }
  0x3b   :  { %430 = vmatpush.bf16.msrb.mxu0 %v1031_v32  ;;  %v1164_v32 = vld [vmem:[#allocation5 + $0x1f8] sm:$0xf0]  ;;  %v1368_v53 = vld [vmem:[#allocation5 + $0x244] sm:$0xf]  ;;  %v1204_v54 = vld [vmem:[#allocation5 + $0x248] sm:$0xf0]  ;;  %v1203_v59 = vor.u32 %v1369_v48, %v1202_v47 }
  0x3c   :  { %443 = vmatpush.bf16.msrb.mxu1 %v1095_v33  ;;  %423 = vmatpush.bf16.msra.mxu3 %v1043_v13  ;;  %v1223_v33 = vor.u32 %v1372_v26, %v1220_v27  ;;  %v1167_v35 = vor.u32 %v1358_v31, %v1164_v32  ;;  %v1148_v55 = vld [vmem:[#allocation5 + $0x1d8] sm:$0xf0]  ;;  %v1138_v58 = vld [vmem:[#allocation5 + $0x1c0] sm:$0xf]  ;;  %v1353_v60 = vld [vmem:[#allocation5 + $0x1c4] sm:$0xf0]  ;;  %v1207_v63 = vor.u32 %v1368_v53, %v1204_v54 }
  0x3d   :  { %653 = vmatpush.bf16.msrb.mxu2 %v1163_v34  ;;  %v1352_v61 = vld [vmem:[#allocation5 + $0x1c4] sm:$0xf]  ;;  %v1140_v62 = vld [vmem:[#allocation5 + $0x1c8] sm:$0xf0]  ;;  %v1194_v0 = vld [vmem:[#allocation5 + $0x230] sm:$0xf]  ;;  %v1139_v4 = vor.u32 %v1353_v60, %v1138_v58 }
  0x3e   :  { %v1367_v1 = vld [vmem:[#allocation5 + $0x234] sm:$0xf0]  ;;  %v1366_v2 = vld [vmem:[#allocation5 + $0x234] sm:$0xf]  ;;  %v1186_v8 = vld [vmem:[#allocation5 + $0x220] sm:$0xf] }
  0x3f   :  { %431 = vmatpush.bf16.msrb.mxu0 %v1023_v38  ;;  %v1370_v38 = vld [vmem:[#allocation5 + $0x254] sm:$0xf]  ;;  %v1195_v6 = vor.u32 %v1367_v1, %v1194_v0  ;;  %v1365_v9 = vld [vmem:[#allocation5 + $0x224] sm:$0xf0]  ;;  %v1579_v10 = vld [vmem:[#allocation8] sm:$0xff]  ;;  %s898_s3 = sshll.u32 %s1541_s2, 4  ;;  %s899_s3 = int_to_ptr.vmem [resolvable:$true] %s898_s3 }
  0x40   :  { %444 = vmatpush.bf16.msrb.mxu1 %v1087_v39  ;;  %666 = vmatpush.bf16.msrb.mxu3 %v1227_v21  ;;  %v1212_v39 = vld [vmem:[#allocation5 + $0x258] sm:$0xf0]  ;;  %v1364_v11 = vld [vmem:[#allocation5 + $0x224] sm:$0xf]  ;;  %v1188_v12 = vld [vmem:[#allocation5 + $0x228] sm:$0xf0] }
  0x41   :  { %v1215_v49 = vor.u32 %v1370_v38, %v1212_v39  ;;  %654 = vmatpush.bf16.msrb.mxu2 %v1155_v42  ;;  %v1581_v13 = vld [vmem:[#allocation8 + $0x8] sm:$0xff]  ;;  %v97_v15 = vperm.slane %v1579_v10, 0  ;;  %v1191_v16 = vor.u32 %v1364_v11, %v1188_v12  ;;  %v1130_v28 = vld [vmem:[#allocation5 + $0x1b0] sm:$0xf]  ;;  %v1350_v30 = vld [vmem:[#allocation5 + $0x1b4] sm:$0xf] }
  0x42   :  { %v1132_v32 = vld [vmem:[#allocation5 + $0x1b8] sm:$0xf0]  ;;  %v1178_v34 = vld [vmem:[#allocation5 + $0x210] sm:$0xf]  ;;  %v1122_v40 = vld [vmem:[#allocation5 + $0x1a0] sm:$0xf] }
  0x43   :  { %432 = vmatpush.bf16.msrb.mxu0 %v1015_v44  ;;  %v1156_v44 = vld [vmem:[#allocation5 + $0x1e8] sm:$0xf0]  ;;  %v1180_v38 = vld [vmem:[#allocation5 + $0x218] sm:$0xf0]  ;;  %v1349_v41 = vld [vmem:[#allocation5 + $0x1a4] sm:$0xf0] }
  0x44   :  { %445 = vmatpush.bf16.msrb.mxu1 %v1079_v45  ;;  %667 = vmatpush.bf16.msrb.mxu3 %v1219_v29  ;;  %v1211_v45 = vor.u32 %v1371_v37, %v1210_v36  ;;  %v1159_v46 = vor.u32 %v1356_v43, %v1156_v44  ;;  %v1351_v29 = vld [vmem:[#allocation5 + $0x1b4] sm:$0xf0]  ;;  %v1362_v36 = vld [vmem:[#allocation5 + $0x214] sm:$0xf]  ;;  %v1348_v42 = vld [vmem:[#allocation5 + $0x1a4] sm:$0xf]  ;;  %v1123_v43 = vor.u32 %v1349_v41, %v1122_v40 }
  0x45   :  { %v1131_v31 = vor.u32 %v1351_v29, %v1130_v28  ;;  %v1183_v39 = vor.u32 %v1362_v36, %v1180_v38  ;;  %v1124_v44 = vld [vmem:[#allocation5 + $0x1a8] sm:$0xf0]  ;;  %v1361_v47 = vld [vmem:[#allocation5 + $0x204] sm:$0xf0]  ;;  %v1360_v48 = vld [vmem:[#allocation5 + $0x204] sm:$0xf] }
  0x46   :  { %v1347_v53 = vld [vmem:[#allocation5 + $0x194] sm:$0xf0]  ;;  %v1106_v58 = vld [vmem:[#allocation5 + $0x180] sm:$0xf]  ;;  %v1344_v60 = vld [vmem:[#allocation5 + $0x184] sm:$0xf] }
  0x47   :  { %433 = vmatpush.bf16.msrb.mxu0 %v1007_v50  ;;  %v1146_v50 = vld [vmem:[#allocation5 + $0x1d0] sm:$0xf]  ;;  %v1391_v0 = vld [vmem:[#allocation7 + $0x78] sm:$0xff]  ;;  %v1380_v28 = vld [vmem:[#allocation7 + $0x20] sm:$0xff]  ;;  %s900_s13 = sshll.u32 %s1597_s4, 4  ;;  %s901_s13 = int_to_ptr.hbm [resolvable:$true] %s900_s13 }
  0x48   :  { %446 = vmatpush.bf16.msrb.mxu1 %v1071_v51  ;;  %v1355_v51 = vld [vmem:[#allocation5 + $0x1d4] sm:$0xf0]  ;;  %668 = vmatpush.bf16.msrb.mxu3 %v1211_v45  ;;  %v1127_v45 = vor.u32 %v1348_v42, %v1124_v44  ;;  %v1386_v29 = vld [vmem:[#allocation7 + $0x50] sm:$0xff] }
  0x49   :  { %v1383_v1 = vld [vmem:[#allocation7 + $0x38] sm:$0xff] }
  0x4b   :  { %434 = vmatpush.bf16.msrb.mxu0 %v999_v56  ;;  %v1147_v56 = vor.u32 %v1355_v51, %v1146_v50  ;;  %v1172_v50 = vld [vmem:[#allocation5 + $0x208] sm:$0xf0] }
  0x4c   :  { %447 = vmatpush.bf16.msrb.mxu1 %v1063_v57  ;;  %v1151_v57 = vor.u32 %v1354_v52, %v1148_v55  ;;  %669 = vmatpush.bf16.msrb.mxu3 %v1203_v59  ;;  %v1175_v51 = vor.u32 %v1360_v48, %v1172_v50  ;;  %v1114_v52 = vld [vmem:[#allocation5 + $0x190] sm:$0xf]  ;;  %v1346_v55 = vld [vmem:[#allocation5 + $0x194] sm:$0xf]  ;;  %v1345_v59 = vld [vmem:[#allocation5 + $0x184] sm:$0xf0] }
  0x4d   :  { %655 = vmatpush.bf16.msrb.mxu2 %v1147_v56  ;;  %v1115_v54 = vor.u32 %v1347_v53, %v1114_v52  ;;  %v1116_v56 = vld [vmem:[#allocation5 + $0x198] sm:$0xf0] }
  0x4f   :  { %435 = vmatpush.bf16.msrb.mxu0 %v991_v3  ;;  %v1196_v3 = vld [vmem:[#allocation5 + $0x238] sm:$0xf0] }
  0x50   :  { %448 = vmatpush.bf16.msrb.mxu1 %v1055_v5  ;;  %v1143_v5 = vor.u32 %v1352_v61, %v1140_v62  ;;  %v1199_v7 = vor.u32 %v1366_v2, %v1196_v3  ;;  %670 = vmatpush.bf16.msrb.mxu3 %v1195_v6  ;;  %v1107_v61 = vor.u32 %v1345_v59, %v1106_v58  ;;  %v1108_v62 = vld [vmem:[#allocation5 + $0x188] sm:$0xf0]  ;;  %v1390_v2 = vld [vmem:[#allocation7 + $0x70] sm:$0xff]  ;;  %v1388_v6 = vld [vmem:[#allocation7 + $0x60] sm:$0xff] }
  0x51   :  { %656 = vmatpush.bf16.msrb.mxu2 %v1139_v4  ;;  %v1382_v3 = vld [vmem:[#allocation7 + $0x30] sm:$0xff]  ;;  %v1389_v4 = vld [vmem:[#allocation7 + $0x68] sm:$0xff] }
  0x53   :  { %436 = vmatpush.bf16.msrb.mxu0 %v983_v14  ;;  %v1187_v14 = vor.u32 %v1365_v9, %v1186_v8 }
  0x54   :  { %449 = vmatpush.bf16.msrb.mxu1 %v1047_v17  ;;  %v98_v17 = vperm.slane %v1581_v13, 0 }
  0x55   :  { %671 = vmatpush.bf16.msrb.mxu3 %v1187_v14  ;;  %657 = vmatpush.bf16.msrb.mxu2 %v1131_v31  ;;  %v241_v14 = vperm.slane %v1579_v10, 1  ;;  %v1385_v31 = vld [vmem:[#allocation7 + $0x48] sm:$0xff] }
  0x57   :  { %679 = vmatpush.bf16.msra.mxu0 %v1167_v35  ;;  %v1363_v35 = vld [vmem:[#allocation5 + $0x214] sm:$0xf0] }
  0x58   :  { %692 = vmatpush.bf16.msra.mxu1 %v1231_v25  ;;  %v1179_v37 = vor.u32 %v1363_v35, %v1178_v34  ;;  %v1377_v34 = vld [vmem:[#allocation7 + $0x8] sm:$0xff]  ;;  %v1376_v35 = vld [vmem:[#allocation7] sm:$0xff] }
  0x59   :  { %658 = vmatpush.bf16.msrb.mxu2 %v1123_v43  ;;  %v491_v43 = vperm.slane %v1579_v10, 2 }
  0x5a   :  { %672 = vmatpush.bf16.msrb.mxu3 %v1179_v37  ;;  %v492_v37 = vperm.slane %v1581_v13, 2 }
  0x5b   :  { %680 = vmatpush.bf16.msra.mxu0 %v1159_v46  ;;  %v1170_v46 = vld [vmem:[#allocation5 + $0x200] sm:$0xf] }
  0x5c   :  { %693 = vmatpush.bf16.msra.mxu1 %v1223_v33  ;;  %v1135_v33 = vor.u32 %v1350_v30, %v1132_v32  ;;  %v1379_v30 = vld [vmem:[#allocation7 + $0x18] sm:$0xff]  ;;  %v1378_v32 = vld [vmem:[#allocation7 + $0x10] sm:$0xff] }
  0x5d   :  { %659 = vmatpush.bf16.msrb.mxu2 %v1115_v54  ;;  %v864_v54 = vlaneseq }
  0x5f   :  { %681 = vmatpush.bf16.msra.mxu0 %v1151_v57  ;;  %v1119_v57 = vor.u32 %v1346_v55, %v1116_v56  ;;  %v741_v55 = vperm.slane %v1579_v10, 3  ;;  %v865_v56 = vand.u32 127, %v864_v54 }
  0x60   :  { %694 = vmatpush.bf16.msra.mxu1 %v1215_v49  ;;  %v1171_v49 = vor.u32 %v1361_v47, %v1170_v46 }
  0x61   :  { %660 = vmatpush.bf16.msrb.mxu2 %v1107_v61  ;;  %vm866_vm0 = vcmp.lt.s32.totalorder %v865_v56, 25  ;;  %vm890_vm5 = vcmp.eq.s32.totalorder %v865_v56, 25 }
  0x62   :  { %673 = vmatpush.bf16.msrb.mxu3 %v1171_v49 }
  0x63   :  { %682 = vmatpush.bf16.msra.mxu0 %v1143_v5  ;;  %v1381_v5 = vld [vmem:[#allocation7 + $0x28] sm:$0xff] }
  0x64   :  { %695 = vmatpush.bf16.msra.mxu1 %v1207_v63  ;;  %v1111_v63 = vor.u32 %v1344_v60, %v1108_v62 }
  0x67   :  { %683 = vmatpush.bf16.msra.mxu0 %v1135_v33  ;;  %v1384_v33 = vld [vmem:[#allocation7 + $0x40] sm:$0xff] }
  0x68   :  { %696 = vmatpush.bf16.msra.mxu1 %v1199_v7  ;;  %v242_v7 = vperm.slane %v1581_v13, 1 }
  0x6b   :  { %684 = vmatpush.bf16.msra.mxu0 %v1127_v45 }
  0x6c   :  { %697 = vmatpush.bf16.msra.mxu1 %v1191_v16 }
  0x6f   :  { %685 = vmatpush.bf16.msra.mxu0 %v1119_v57 }
  0x70   :  { %698 = vmatpush.bf16.msra.mxu1 %v1183_v39 }
  0x73   :  { %686 = vmatpush.bf16.msra.mxu0 %v1111_v63 }
  0x74   :  { %699 = vmatpush.bf16.msra.mxu1 %v1175_v51 }
  0xb3   :  { %v188_v18 = vpop.f32.mrf.mxu0 }
  0xb4   :  { %v189_v19 = vadd.f32 %v188_v18, %v97_v15  ;;  %v201_v20 = vpop.f32.mrf.mxu1 }
  0xb5   :  { %v202_v21 = vadd.f32 %v201_v20, %v98_v17 }
  0xb6   :  { %v205_v22 = vmax.f32 %v189_v19, 0.0 }
  0xb7   :  { %v206_v23 = vmax.f32 %v202_v21, 0.0 }
  0xb8   :  { %v207_v24 = vpack.c.bf16 %v205_v22, %v205_v22 }
  0xb9   :  { %v208_v25 = vpack.c.bf16 %v206_v23, %v206_v23 }
  0xba   :  { %411 = vmatmul.bf16.vlgmr.msra.gmra.mxu2 %v207_v24  ;;  %437 = vmatmul.bf16.vlgmr.msrb.gmra.mxu0 %v207_v24 }
  0xbb   :  { %424 = vmatmul.bf16.vlgmr.msra.gmra.mxu3 %v208_v25  ;;  %450 = vmatmul.bf16.vlgmr.msrb.gmra.mxu1 %v208_v25  ;;  %v190_v26 = vpop.f32.mrf.mxu0 }
  0xbc   :  { %v203_v27 = vpop.f32.mrf.mxu1  ;;  %851 = vmatpush.bf16.msra.mxu3 %v1391_v0  ;;  %838 = vmatpush.bf16.msra.mxu2 %v1383_v1 }
  0xbd   :  { %v1387_v27 = vld [vmem:[#allocation7 + $0x58] sm:$0xff] }
  0xc0   :  { %852 = vmatpush.bf16.msra.mxu3 %v1390_v2  ;;  %839 = vmatpush.bf16.msra.mxu2 %v1382_v3 }
  0xc4   :  { %853 = vmatpush.bf16.msra.mxu3 %v1389_v4  ;;  %840 = vmatpush.bf16.msra.mxu2 %v1381_v5 }
  0xc8   :  { %854 = vmatpush.bf16.msra.mxu3 %v1388_v6  ;;  %841 = vmatpush.bf16.msra.mxu2 %v1380_v28 }
  0xcc   :  { %855 = vmatpush.bf16.msra.mxu3 %v1387_v27  ;;  %842 = vmatpush.bf16.msra.mxu2 %v1379_v30 }
  0xd0   :  { %856 = vmatpush.bf16.msra.mxu3 %v1386_v29  ;;  %843 = vmatpush.bf16.msra.mxu2 %v1378_v32 }
  0xd4   :  { %857 = vmatpush.bf16.msra.mxu3 %v1385_v31  ;;  %844 = vmatpush.bf16.msra.mxu2 %v1377_v34 }
  0xd8   :  { %858 = vmatpush.bf16.msra.mxu3 %v1384_v33  ;;  %845 = vmatpush.bf16.msra.mxu2 %v1376_v35 }
 0x137   :  { %v438_v8 = vpop.f32.mrf.mxu0 }
 0x138   :  { %v439_v9 = vadd.f32 %v438_v8, %v242_v7  ;;  %v451_v11 = vpop.f32.mrf.mxu1 }
 0x13a   :  { %v452_v12 = vadd.f32 %v451_v11, %v439_v9 }
 0x13c   :  { %v456_v15 = vmax.f32 %v452_v12, 0.0 }
 0x13d   :  { %v412_v16 = vpop.f32.mrf.mxu2 }
 0x13e   :  { %v458_v17 = vpack.c.bf16 %v456_v15, %v456_v15  ;;  %v413_v18 = vadd.f32 %v412_v16, %v241_v14  ;;  %v425_v19 = vpop.f32.mrf.mxu3 }
 0x13f   :  { %v440_v20 = vpop.f32.mrf.mxu0 }
 0x140   :  { %v426_v21 = vadd.f32 %v425_v19, %v413_v18  ;;  %v453_v22 = vpop.f32.mrf.mxu1  ;;  %674 = vmatmul.bf16.vlgmr.msrb.gmra.mxu3 %v458_v17  ;;  %700 = vmatmul.bf16.vlgmr.msra.gmra.mxu1 %v458_v17 }
 0x142   :  { %v455_v23 = vmax.f32 %v426_v21, 0.0 }
 0x144   :  { %v457_v24 = vpack.c.bf16 %v455_v23, %v455_v23 }
 0x145   :  { %v414_v25 = vpop.f32.mrf.mxu2 }
 0x146   :  { %v427_v26 = vpop.f32.mrf.mxu3  ;;  %661 = vmatmul.bf16.vlgmr.msrb.gmra.mxu2 %v457_v24  ;;  %687 = vmatmul.bf16.vlgmr.msra.gmra.mxu0 %v457_v24 }
 0x1bd   :  { %v701_v36 = vpop.f32.mrf.mxu1 }
 0x1c3   :  { %v675_v38 = vpop.f32.mrf.mxu3  ;;  %v688_v39 = vpop.f32.mrf.mxu0 }
 0x1c4   :  { %v689_v40 = vadd.f32 %v688_v39, %v492_v37 }
 0x1c5   :  { %v703_v41 = vpop.f32.mrf.mxu1 }
 0x1c6   :  { %v702_v42 = vadd.f32 %v701_v36, %v689_v40 }
 0x1c8   :  { %v706_v44 = vmax.f32 %v702_v42, 0.0 }
 0x1c9   :  { %v662_v45 = vpop.f32.mrf.mxu2 }
 0x1ca   :  { %v708_v46 = vpack.c.bf16 %v706_v44, %v706_v44  ;;  %v663_v47 = vadd.f32 %v662_v45, %v491_v43 }
 0x1cb   :  { %v677_v48 = vpop.f32.mrf.mxu3  ;;  %v690_v49 = vpop.f32.mrf.mxu0 }
 0x1cc   :  { %v676_v50 = vadd.f32 %v675_v38, %v663_v47  ;;  %859 = vmatmul.bf16.vlgmr.msra.gmra.mxu3 %v708_v46 }
 0x1ce   :  { %v705_v51 = vmax.f32 %v676_v50, 0.0 }
 0x1d0   :  { %v707_v52 = vpack.c.bf16 %v705_v51, %v705_v51 }
 0x1d1   :  { %v664_v53 = vpop.f32.mrf.mxu2 }
 0x1d2   :  { %846 = vmatmul.bf16.vlgmr.msra.gmra.mxu2 %v707_v52 }
 0x24f   :  { %v860_v13 = vpop.f32.mrf.mxu3 }
 0x255   :  { %v847_v57 = vpop.f32.mrf.mxu2 }
 0x256   :  { %v848_v58 = vadd.f32 %v847_v57, %v741_v55 }
 0x257   :  { %v862_v59 = vpop.f32.mrf.mxu3 }
 0x258   :  { %v861_v60 = vadd.f32 %v860_v13, %v848_v58 }
 0x25a   :  { %v867_v61 = vsel %vm866_vm0, %v861_v60, -1e+30 }
 0x25b   :  { %868 = vmax.xlane.f32.xlu0 %v867_v61 }
 0x25d   :  { %v849_v62 = vpop.f32.mrf.mxu2 }
 0x2ce   :  { %v869_v63 = vpop.xlane.xlu0 %868 }
 0x2cf   :  { %v870_v0 = vsub.f32 %v867_v61, %v869_v63 }
 0x2d1   :  { %v871_v1 = vmul.f32 1.442695, %v870_v0 }
 0x2d3   :  { %1401 = vpow2.f32 %v871_v1 }
 0x2d9   :  { %v1402_v2 = vpop.eup %1401 }
 0x2da   :  { %873 = vadd.xlane.f32.xlu0 %v1402_v2 }
 0x34d   :  { %v874_v3 = vpop.xlane.xlu0 %873 }
 0x34e   :  { %1403 = vrcp.f32 %v874_v3  ;;  %v886_v6 = vand.u32 2147483648, %v874_v3  ;;  %v884_v8 = vand.u32 2147483647, %v874_v3  ;;  %vm880_vm2 = vweird.f32 %v874_v3 }
 0x350   :  { %v887_v11 = vor.u32 1.1754944e-38, %v886_v6  ;;  %vm885_vm4 = vcmp.eq.f32.partialorder %v884_v8, 8.507059e+37 }
 0x354   :  { %v1404_v4 = vpop.eup %1403 }
 0x355   :  { %v876_v5 = vmul.f32 %v1404_v4, %v874_v3  ;;  %vm881_vm1 = vweird.f32 %v1404_v4 }
 0x356   :  { %vm882_vm3 = vmor %vm880_vm2, %vm881_vm1 }
 0x357   :  { %v877_v10 = vsub.f32 1.0, %v876_v5 }
 0x359   :  { %v878_v7 = vmul.f32 %v1404_v4, %v877_v10 }
 0x35b   :  { %v879_v9 = vadd.f32 %v1404_v4, %v878_v7 }
 0x35d   :  { %v883_v12 = vsel %vm882_vm3, %v1404_v4, %v879_v9 }
 0x35e   :  { %v888_v14 = vsel %vm885_vm4, %v887_v11, %v883_v12 }
 0x35f   :  { %v889_v15 = vmul.f32 %v1402_v2, %v888_v14 }
 0x361   :  { %v891_v16 = vsel %vm890_vm5, %v861_v60, %v889_v15 }
 0x362   :  { %892 = vst [vmem:[#allocation10] sm:$0xff] %v891_v16 }
 0x363   :  { %903 = dma.vmem_to_hbm [thread:$0]  %s899_s3, 128, %s901_s13, [#allocation4]  }
 0x364   :  { %1531 = dma.done.wait [#allocation4], 128  }
 0x365   :  { %1532 = vsyncadd [#allocation4], 4294967168 }
 0x366   :  { %908 = vsyncpa [#allocation3], 1 }
 0x367   :  { %909 = vsyncpa [#allocation6], 1 }
 0x368   :  { %910 = vsyncpa [#allocation9], 1 }
 0x369   :  { %911 = vsyncpa [#allocation4], 1 }

// kernel: tpu_custom_call.1
= control target key start
LH: loop header
LB: loop body
LE: loop exit
PB: predicated region body
PF: predicated region fallthrough
CT: control target
= control target key end

     0   :  { %9 = vsyncpa [#allocation3], 0  ;;  %s1593_s0 = inlined_call_operand.hbm [shape: f32[8,128], index: 0, kind: input, shape index: {}]   ;;  %s1594_s1 = inlined_call_operand.hbm [shape: bf16[640,256], index: 1, kind: input, shape index: {}]   ;;  %s1595_s2 = inlined_call_operand.hbm [shape: bf16[256,128], index: 2, kind: input, shape index: {}]   ;;  %s1596_s3 = inlined_call_operand.hbm [shape: f32[8,256], index: 3, kind: input, shape index: {}]   ;;  %s1597_s4 = inlined_call_operand.hbm [shape: f32[8,128], index: 4, kind: output, shape index: {}]  }
   0x1   :  { %10 = vsyncpa [#allocation6], 0 }
   0x2   :  { %11 = vsyncpa [#allocation9], 0  ;;  %s28_s17 = sshll.u32 %s1594_s1, 4  ;;  %s29_s17 = int_to_ptr.hbm [resolvable:$true] %s28_s17 }
   0x3   :  { %12 = vsyncpa [#allocation4], 0  ;;  %s1533_s18 = smov [#allocation5]   ;;  %s18_s22 = sshll.u32 %s1593_s0, 4  ;;  %s19_s22 = int_to_ptr.hbm [resolvable:$true] %s18_s22 }
   0x4   :  { %s30_s19 = sshll.u32 %s1533_s18, 4  ;;  %s1534_s23 = smov 128   ;;  %s31_s19 = int_to_ptr.vmem [resolvable:$true] %s30_s19 }
   0x5   :  { %s1535_s24 = smov 8   ;;  %s1536_s25 = smov [#allocation2]  }
   0x6   :  { %36 = dma.hbm_to_vmem [thread:$0]  %s29_s17, 10240, %s31_s19, [#allocation6], %s1534_s23, %s1534_s23, %s1535_s24  }
   0x7   :  { %s20_s26 = sshll.u32 %s1536_s25, 4  ;;  %s41_s29 = sshll.u32 %s1595_s2, 4  ;;  %s21_s26 = int_to_ptr.vmem [resolvable:$true] %s20_s26  ;;  %s42_s29 = int_to_ptr.hbm [resolvable:$true] %s41_s29 }
   0x8   :  { %23 = dma.hbm_to_vmem [thread:$0]  %s19_s22, 128, %s21_s26, [#allocation3]  }
   0x9   :  { %s1537_s1 = smov [#allocation7]   ;;  %s55_s0 = sshll.u32 %s1596_s3, 4  ;;  %s56_s0 = int_to_ptr.hbm [resolvable:$true] %s55_s0 }
   0xa   :  { %s43_s30 = sshll.u32 %s1537_s1, 4  ;;  %s1538_s7 = smov 64   ;;  %s44_s30 = int_to_ptr.vmem [resolvable:$true] %s43_s30 }
   0xb   :  { %s1539_s8 = smov 4   ;;  %s1540_s9 = smov [#allocation8]  }
   0xc   :  { %49 = dma.hbm_to_vmem [thread:$0]  %s42_s29, 2048, %s44_s30, [#allocation6], %s1538_s7, %s1538_s7, %s1539_s8  }
   0xd   :  { %s57_s10 = sshll.u32 %s1540_s9, 4  ;;  %s58_s10 = int_to_ptr.vmem [resolvable:$true] %s57_s10 }
   0xe   :  { %60 = dma.hbm_to_vmem [thread:$0]  %s56_s0, 256, %s58_s10, [#allocation9]  }
   0xf   :  { %1525 = dma.done.wait [#allocation3], 128  }
  0x10   :  { %1526 = vsyncadd [#allocation3], 4294967168 }
  0x11   :  { %1527 = dma.done.wait [#allocation6], 12288  }
  0x12   :  { %1528 = vsyncadd [#allocation6], 4294955008 }
  0x13   :  { %1529 = dma.done.wait [#allocation9], 256  }
  0x14   :  { %1530 = vsyncadd [#allocation9], 4294967040  ;;  %v970_v0 = vld [vmem:[#allocation5 + $0x70] sm:$0xf]  ;;  %v1311_v1 = vld [vmem:[#allocation5 + $0x74] sm:$0xf0] }
  0x15   :  { %v1310_v2 = vld [vmem:[#allocation5 + $0x74] sm:$0xf]  ;;  %v971_v3 = vor.u32 %v1311_v1, %v970_v0  ;;  %v972_v4 = vld [vmem:[#allocation5 + $0x78] sm:$0xf0]  ;;  %v962_v5 = vld [vmem:[#allocation5 + $0x60] sm:$0xf] }
  0x16   :  { %v1309_v6 = vld [vmem:[#allocation5 + $0x64] sm:$0xf0]  ;;  %v975_v7 = vor.u32 %v1310_v2, %v972_v4  ;;  %v1308_v8 = vld [vmem:[#allocation5 + $0x64] sm:$0xf]  ;;  %v964_v9 = vld [vmem:[#allocation5 + $0x68] sm:$0xf0] }
  0x17   :  { %179 = vmatpush.bf16.msra.mxu0 %v971_v3  ;;  %v963_v10 = vor.u32 %v1309_v6, %v962_v5  ;;  %v967_v11 = vor.u32 %v1308_v8, %v964_v9  ;;  %v954_v12 = vld [vmem:[#allocation5 + $0x50] sm:$0xf]  ;;  %v1307_v13 = vld [vmem:[#allocation5 + $0x54] sm:$0xf0]  ;;  %v1306_v14 = vld [vmem:[#allocation5 + $0x54] sm:$0xf] }
  0x18   :  { %192 = vmatpush.bf16.msra.mxu1 %v975_v7  ;;  %v956_v15 = vld [vmem:[#allocation5 + $0x58] sm:$0xf0]  ;;  %v955_v16 = vor.u32 %v1307_v13, %v954_v12  ;;  %v946_v18 = vld [vmem:[#allocation5 + $0x40] sm:$0xf]  ;;  %v1305_v19 = vld [vmem:[#allocation5 + $0x44] sm:$0xf0] }
  0x19   :  { %v959_v17 = vor.u32 %v1306_v14, %v956_v15  ;;  %v1304_v20 = vld [vmem:[#allocation5 + $0x44] sm:$0xf]  ;;  %v948_v21 = vld [vmem:[#allocation5 + $0x48] sm:$0xf0]  ;;  %v947_v22 = vor.u32 %v1305_v19, %v946_v18  ;;  %v1034_v23 = vld [vmem:[#allocation5 + $0xf0] sm:$0xf] }
  0x1a   :  { %v1327_v24 = vld [vmem:[#allocation5 + $0xf4] sm:$0xf0]  ;;  %v1098_v25 = vld [vmem:[#allocation5 + $0x170] sm:$0xf]  ;;  %v951_v26 = vor.u32 %v1304_v20, %v948_v21  ;;  %v1302_v31 = vld [vmem:[#allocation5 + $0x34] sm:$0xf] }
  0x1b   :  { %180 = vmatpush.bf16.msra.mxu0 %v963_v10  ;;  %v938_v27 = vld [vmem:[#allocation5 + $0x30] sm:$0xf]  ;;  %v1303_v28 = vld [vmem:[#allocation5 + $0x34] sm:$0xf0]  ;;  %v1035_v29 = vor.u32 %v1327_v24, %v1034_v23  ;;  %v940_v32 = vld [vmem:[#allocation5 + $0x38] sm:$0xf0] }
  0x1c   :  { %193 = vmatpush.bf16.msra.mxu1 %v967_v11  ;;  %v1343_v30 = vld [vmem:[#allocation5 + $0x174] sm:$0xf0]  ;;  %v1026_v34 = vld [vmem:[#allocation5 + $0xe0] sm:$0xf]  ;;  %v1325_v35 = vld [vmem:[#allocation5 + $0xe4] sm:$0xf0]  ;;  %v939_v38 = vor.u32 %v1303_v28, %v938_v27  ;;  %v943_v43 = vor.u32 %v1302_v31, %v940_v32 }
  0x1d   :  { %v1099_v33 = vor.u32 %v1343_v30, %v1098_v25  ;;  %403 = vmatpush.bf16.msra.mxu2 %v1035_v29  ;;  %v1090_v36 = vld [vmem:[#allocation5 + $0x160] sm:$0xf]  ;;  %v1341_v37 = vld [vmem:[#allocation5 + $0x164] sm:$0xf0]  ;;  %v1027_v41 = vor.u32 %v1325_v35, %v1026_v34  ;;  %v1300_v44 = vld [vmem:[#allocation5 + $0x24] sm:$0xf] }
  0x1e   :  { %v930_v39 = vld [vmem:[#allocation5 + $0x20] sm:$0xf]  ;;  %v1301_v40 = vld [vmem:[#allocation5 + $0x24] sm:$0xf0]  ;;  %v1091_v42 = vor.u32 %v1341_v37, %v1090_v36  ;;  %v1018_v45 = vld [vmem:[#allocation5 + $0xd0] sm:$0xf] }
  0x1f   :  { %181 = vmatpush.bf16.msra.mxu0 %v955_v16  ;;  %416 = vmatpush.bf16.msra.mxu3 %v1099_v33  ;;  %v1323_v46 = vld [vmem:[#allocation5 + $0xd4] sm:$0xf0]  ;;  %v932_v47 = vld [vmem:[#allocation5 + $0x28] sm:$0xf0]  ;;  %v1082_v48 = vld [vmem:[#allocation5 + $0x150] sm:$0xf]  ;;  %v931_v51 = vor.u32 %v1301_v40, %v930_v39 }
  0x20   :  { %194 = vmatpush.bf16.msra.mxu1 %v959_v17  ;;  %v1339_v49 = vld [vmem:[#allocation5 + $0x154] sm:$0xf0]  ;;  %v1019_v50 = vor.u32 %v1323_v46, %v1018_v45  ;;  %v922_v52 = vld [vmem:[#allocation5 + $0x10] sm:$0xf]  ;;  %v1010_v54 = vld [vmem:[#allocation5 + $0xc0] sm:$0xf]  ;;  %v935_v56 = vor.u32 %v1300_v44, %v932_v47 }
  0x21   :  { %404 = vmatpush.bf16.msra.mxu2 %v1027_v41  ;;  %v1083_v53 = vor.u32 %v1339_v49, %v1082_v48  ;;  %v1321_v55 = vld [vmem:[#allocation5 + $0xc4] sm:$0xf0]  ;;  %v1299_v57 = vld [vmem:[#allocation5 + $0x14] sm:$0xf0]  ;;  %v1074_v58 = vld [vmem:[#allocation5 + $0x140] sm:$0xf] }
  0x22   :  { %v1337_v59 = vld [vmem:[#allocation5 + $0x144] sm:$0xf0]  ;;  %v1298_v60 = vld [vmem:[#allocation5 + $0x14] sm:$0xf]  ;;  %v924_v61 = vld [vmem:[#allocation5 + $0x18] sm:$0xf0]  ;;  %v1011_v63 = vor.u32 %v1321_v55, %v1010_v54  ;;  %v923_v0 = vor.u32 %v1299_v57, %v922_v52 }
  0x23   :  { %182 = vmatpush.bf16.msra.mxu0 %v947_v22  ;;  %417 = vmatpush.bf16.msra.mxu3 %v1091_v42  ;;  %v914_v62 = vld [vmem:[#allocation5] sm:$0xf]  ;;  %v1297_v1 = vld [vmem:[#allocation5 + $0x4] sm:$0xf0]  ;;  %v1075_v2 = vor.u32 %v1337_v59, %v1074_v58  ;;  %v1002_v3 = vld [vmem:[#allocation5 + $0xb0] sm:$0xf]  ;;  %v927_v5 = vor.u32 %v1298_v60, %v924_v61 }
  0x24   :  { %195 = vmatpush.bf16.msra.mxu1 %v951_v26  ;;  %v1319_v4 = vld [vmem:[#allocation5 + $0xb4] sm:$0xf0]  ;;  %v1296_v6 = vld [vmem:[#allocation5 + $0x4] sm:$0xf]  ;;  %v1066_v7 = vld [vmem:[#allocation5 + $0x130] sm:$0xf]  ;;  %v915_v15 = vor.u32 %v1297_v1, %v914_v62 }
  0x25   :  { %405 = vmatpush.bf16.msra.mxu2 %v1019_v50  ;;  %v1335_v8 = vld [vmem:[#allocation5 + $0x134] sm:$0xf0]  ;;  %v916_v9 = vld [vmem:[#allocation5 + $0x8] sm:$0xf0]  ;;  %v1326_v10 = vld [vmem:[#allocation5 + $0xf4] sm:$0xf]  ;;  %v1003_v14 = vor.u32 %v1319_v4, %v1002_v3 }
  0x26   :  { %v1036_v11 = vld [vmem:[#allocation5 + $0xf8] sm:$0xf0]  ;;  %v1342_v12 = vld [vmem:[#allocation5 + $0x174] sm:$0xf]  ;;  %v1067_v17 = vor.u32 %v1335_v8, %v1066_v7  ;;  %v994_v18 = vld [vmem:[#allocation5 + $0xa0] sm:$0xf]  ;;  %v919_v20 = vor.u32 %v1296_v6, %v916_v9 }
  0x27   :  { %183 = vmatpush.bf16.msra.mxu0 %v939_v38  ;;  %418 = vmatpush.bf16.msra.mxu3 %v1083_v53  ;;  %v1100_v13 = vld [vmem:[#allocation5 + $0x178] sm:$0xf0]  ;;  %v1317_v19 = vld [vmem:[#allocation5 + $0xa4] sm:$0xf0]  ;;  %v1039_v21 = vor.u32 %v1326_v10, %v1036_v11  ;;  %v1058_v22 = vld [vmem:[#allocation5 + $0x120] sm:$0xf] }
  0x28   :  { %196 = vmatpush.bf16.msra.mxu1 %v943_v43  ;;  %v79_v16 = vld [vmem:[#allocation2] sm:$0xff]  ;;  %v1333_v23 = vld [vmem:[#allocation5 + $0x124] sm:$0xf0]  ;;  %v1103_v24 = vor.u32 %v1342_v12, %v1100_v13  ;;  %v1324_v25 = vld [vmem:[#allocation5 + $0xe4] sm:$0xf]  ;;  %v995_v30 = vor.u32 %v1317_v19, %v994_v18  ;;  %s1541_s2 = smov [#allocation10]  }
  0x29   :  { %406 = vmatpush.bf16.msra.mxu2 %v1011_v63  ;;  %v1028_v26 = vld [vmem:[#allocation5 + $0xe8] sm:$0xf0]  ;;  %v80_v27 = vpack.c.bf16 %v79_v16, %v79_v16  ;;  %v1340_v28 = vld [vmem:[#allocation5 + $0x164] sm:$0xf]  ;;  %v1059_v31 = vor.u32 %v1333_v23, %v1058_v22  ;;  %v1322_v34 = vld [vmem:[#allocation5 + $0xd4] sm:$0xf] }
  0x2a   :  { %v1092_v29 = vld [vmem:[#allocation5 + $0x168] sm:$0xf0]  ;;  %v1031_v32 = vor.u32 %v1324_v25, %v1028_v26  ;;  %v1020_v35 = vld [vmem:[#allocation5 + $0xd8] sm:$0xf0]  ;;  %v1338_v36 = vld [vmem:[#allocation5 + $0x154] sm:$0xf] }
  0x2b   :  { %184 = vmatpush.bf16.msra.mxu0 %v931_v51  ;;  %419 = vmatpush.bf16.msra.mxu3 %v1075_v2  ;;  %v1095_v33 = vor.u32 %v1340_v28, %v1092_v29  ;;  %v1084_v37 = vld [vmem:[#allocation5 + $0x158] sm:$0xf0]  ;;  %v1023_v38 = vor.u32 %v1322_v34, %v1020_v35  ;;  %v1320_v40 = vld [vmem:[#allocation5 + $0xc4] sm:$0xf]  ;;  %v1012_v41 = vld [vmem:[#allocation5 + $0xc8] sm:$0xf0] }
  0x2c   :  { %197 = vmatpush.bf16.msra.mxu1 %v935_v56  ;;  %v1087_v39 = vor.u32 %v1338_v36, %v1084_v37  ;;  %v1336_v42 = vld [vmem:[#allocation5 + $0x144] sm:$0xf]  ;;  %v1076_v43 = vld [vmem:[#allocation5 + $0x148] sm:$0xf0]  ;;  %v1015_v44 = vor.u32 %v1320_v40, %v1012_v41  ;;  %v1318_v46 = vld [vmem:[#allocation5 + $0xb4] sm:$0xf] }
  0x2d   :  { %407 = vmatpush.bf16.msra.mxu2 %v1003_v14  ;;  %v1079_v45 = vor.u32 %v1336_v42, %v1076_v43  ;;  %v1004_v47 = vld [vmem:[#allocation5 + $0xb8] sm:$0xf0]  ;;  %v1334_v48 = vld [vmem:[#allocation5 + $0x134] sm:$0xf]  ;;  %v1316_v52 = vld [vmem:[#allocation5 + $0xa4] sm:$0xf] }
  0x2e   :  { %v1068_v49 = vld [vmem:[#allocation5 + $0x138] sm:$0xf0]  ;;  %v1007_v50 = vor.u32 %v1318_v46, %v1004_v47  ;;  %v996_v53 = vld [vmem:[#allocation5 + $0xa8] sm:$0xf0]  ;;  %v1332_v54 = vld [vmem:[#allocation5 + $0x124] sm:$0xf] }
  0x2f   :  { %185 = vmatpush.bf16.msra.mxu0 %v923_v0  ;;  %420 = vmatpush.bf16.msra.mxu3 %v1067_v17  ;;  %v1071_v51 = vor.u32 %v1334_v48, %v1068_v49  ;;  %v1060_v55 = vld [vmem:[#allocation5 + $0x128] sm:$0xf0]  ;;  %v999_v56 = vor.u32 %v1316_v52, %v996_v53  ;;  %v986_v58 = vld [vmem:[#allocation5 + $0x90] sm:$0xf]  ;;  %v1315_v59 = vld [vmem:[#allocation5 + $0x94] sm:$0xf0] }
  0x30   :  { %198 = vmatpush.bf16.msra.mxu1 %v927_v5  ;;  %v1063_v57 = vor.u32 %v1332_v54, %v1060_v55  ;;  %v1050_v60 = vld [vmem:[#allocation5 + $0x110] sm:$0xf]  ;;  %v987_v61 = vor.u32 %v1315_v59, %v986_v58  ;;  %v1331_v62 = vld [vmem:[#allocation5 + $0x114] sm:$0xf0]  ;;  %v1314_v63 = vld [vmem:[#allocation5 + $0x94] sm:$0xf] }
  0x31   :  { %408 = vmatpush.bf16.msra.mxu2 %v995_v30  ;;  %v1051_v0 = vor.u32 %v1331_v62, %v1050_v60  ;;  %v988_v1 = vld [vmem:[#allocation5 + $0x98] sm:$0xf0]  ;;  %v1330_v2 = vld [vmem:[#allocation5 + $0x114] sm:$0xf]  ;;  %v978_v6 = vld [vmem:[#allocation5 + $0x80] sm:$0xf] }
  0x32   :  { %v991_v3 = vor.u32 %v1314_v63, %v988_v1  ;;  %v1052_v4 = vld [vmem:[#allocation5 + $0x118] sm:$0xf0]  ;;  %v1313_v7 = vld [vmem:[#allocation5 + $0x84] sm:$0xf0]  ;;  %v1042_v8 = vld [vmem:[#allocation5 + $0x100] sm:$0xf] }
  0x33   :  { %186 = vmatpush.bf16.msra.mxu0 %v915_v15  ;;  %421 = vmatpush.bf16.msra.mxu3 %v1059_v31  ;;  %v1055_v5 = vor.u32 %v1330_v2, %v1052_v4  ;;  %v979_v9 = vor.u32 %v1313_v7, %v978_v6  ;;  %v1329_v10 = vld [vmem:[#allocation5 + $0x104] sm:$0xf0]  ;;  %v1312_v11 = vld [vmem:[#allocation5 + $0x84] sm:$0xf]  ;;  %v980_v12 = vld [vmem:[#allocation5 + $0x88] sm:$0xf0] }
  0x34   :  { %199 = vmatpush.bf16.msra.mxu1 %v919_v20  ;;  %v1043_v13 = vor.u32 %v1329_v10, %v1042_v8  ;;  %v983_v14 = vor.u32 %v1312_v11, %v980_v12  ;;  %v1328_v15 = vld [vmem:[#allocation5 + $0x104] sm:$0xf]  ;;  %v1044_v16 = vld [vmem:[#allocation5 + $0x108] sm:$0xf0]  ;;  %v1226_v18 = vld [vmem:[#allocation5 + $0x270] sm:$0xf] }
  0x35   :  { %409 = vmatpush.bf16.msra.mxu2 %v987_v61  ;;  %v1047_v17 = vor.u32 %v1328_v15, %v1044_v16  ;;  %v1375_v19 = vld [vmem:[#allocation5 + $0x274] sm:$0xf0]  ;;  %v1374_v20 = vld [vmem:[#allocation5 + $0x274] sm:$0xf]  ;;  %v1228_v22 = vld [vmem:[#allocation5 + $0x278] sm:$0xf0] }
  0x36   :  { %187 = vmatmul.bf16.vlgmr.msra.gmra.mxu0 %v80_v27  ;;  %v1218_v23 = vld [vmem:[#allocation5 + $0x260] sm:$0xf]  ;;  %v1231_v25 = vor.u32 %v1374_v20, %v1228_v22  ;;  %v1372_v26 = vld [vmem:[#allocation5 + $0x264] sm:$0xf]  ;;  %v1162_v28 = vld [vmem:[#allocation5 + $0x1f0] sm:$0xf] }
  0x37   :  { %429 = vmatpush.bf16.msrb.mxu0 %v1039_v21  ;;  %200 = vmatmul.bf16.vlgmr.msra.gmra.mxu1 %v80_v27  ;;  %v1227_v21 = vor.u32 %v1375_v19, %v1226_v18  ;;  %v1220_v27 = vld [vmem:[#allocation5 + $0x268] sm:$0xf0]  ;;  %v1359_v30 = vld [vmem:[#allocation5 + $0x1f4] sm:$0xf0]  ;;  %v1358_v31 = vld [vmem:[#allocation5 + $0x1f4] sm:$0xf] }
  0x38   :  { %442 = vmatpush.bf16.msrb.mxu1 %v1103_v24  ;;  %422 = vmatpush.bf16.msra.mxu3 %v1051_v0  ;;  %v1373_v24 = vld [vmem:[#allocation5 + $0x264] sm:$0xf0]  ;;  %v1163_v34 = vor.u32 %v1359_v30, %v1162_v28  ;;  %v1210_v36 = vld [vmem:[#allocation5 + $0x250] sm:$0xf]  ;;  %v1371_v37 = vld [vmem:[#allocation5 + $0x254] sm:$0xf0] }
  0x39   :  { %410 = vmatpush.bf16.msra.mxu2 %v979_v9  ;;  %v1219_v29 = vor.u32 %v1373_v24, %v1218_v23  ;;  %v1154_v40 = vld [vmem:[#allocation5 + $0x1e0] sm:$0xf]  ;;  %v1357_v41 = vld [vmem:[#allocation5 + $0x1e4] sm:$0xf0]  ;;  %v1356_v43 = vld [vmem:[#allocation5 + $0x1e4] sm:$0xf] }
  0x3a   :  { %v1155_v42 = vor.u32 %v1357_v41, %v1154_v40  ;;  %v1202_v47 = vld [vmem:[#allocation5 + $0x240] sm:$0xf]  ;;  %v1369_v48 = vld [vmem:[#allocation5 + $0x244] sm:$0xf0]  ;;  %v1354_v52 = vld [vmem:[#allocation5 + $0x1d4] sm:$0xf] }
  0x3b   :  { %430 = vmatpush.bf16.msrb.mxu0 %v1031_v32  ;;  %v1164_v32 = vld [vmem:[#allocation5 + $0x1f8] sm:$0xf0]  ;;  %v1368_v53 = vld [vmem:[#allocation5 + $0x244] sm:$0xf]  ;;  %v1204_v54 = vld [vmem:[#allocation5 + $0x248] sm:$0xf0]  ;;  %v1203_v59 = vor.u32 %v1369_v48, %v1202_v47 }
  0x3c   :  { %443 = vmatpush.bf16.msrb.mxu1 %v1095_v33  ;;  %423 = vmatpush.bf16.msra.mxu3 %v1043_v13  ;;  %v1223_v33 = vor.u32 %v1372_v26, %v1220_v27  ;;  %v1167_v35 = vor.u32 %v1358_v31, %v1164_v32  ;;  %v1148_v55 = vld [vmem:[#allocation5 + $0x1d8] sm:$0xf0]  ;;  %v1138_v58 = vld [vmem:[#allocation5 + $0x1c0] sm:$0xf]  ;;  %v1353_v60 = vld [vmem:[#allocation5 + $0x1c4] sm:$0xf0]  ;;  %v1207_v63 = vor.u32 %v1368_v53, %v1204_v54 }
  0x3d   :  { %653 = vmatpush.bf16.msrb.mxu2 %v1163_v34  ;;  %v1352_v61 = vld [vmem:[#allocation5 + $0x1c4] sm:$0xf]  ;;  %v1140_v62 = vld [vmem:[#allocation5 + $0x1c8] sm:$0xf0]  ;;  %v1194_v0 = vld [vmem:[#allocation5 + $0x230] sm:$0xf]  ;;  %v1139_v4 = vor.u32 %v1353_v60, %v1138_v58 }
  0x3e   :  { %v1367_v1 = vld [vmem:[#allocation5 + $0x234] sm:$0xf0]  ;;  %v1366_v2 = vld [vmem:[#allocation5 + $0x234] sm:$0xf]  ;;  %v1186_v8 = vld [vmem:[#allocation5 + $0x220] sm:$0xf] }
  0x3f   :  { %431 = vmatpush.bf16.msrb.mxu0 %v1023_v38  ;;  %v1370_v38 = vld [vmem:[#allocation5 + $0x254] sm:$0xf]  ;;  %v1195_v6 = vor.u32 %v1367_v1, %v1194_v0  ;;  %v1365_v9 = vld [vmem:[#allocation5 + $0x224] sm:$0xf0]  ;;  %v1579_v10 = vld [vmem:[#allocation8] sm:$0xff]  ;;  %s898_s3 = sshll.u32 %s1541_s2, 4  ;;  %s899_s3 = int_to_ptr.vmem [resolvable:$true] %s898_s3 }
  0x40   :  { %444 = vmatpush.bf16.msrb.mxu1 %v1087_v39  ;;  %666 = vmatpush.bf16.msrb.mxu3 %v1227_v21  ;;  %v1212_v39 = vld [vmem:[#allocation5 + $0x258] sm:$0xf0]  ;;  %v1364_v11 = vld [vmem:[#allocation5 + $0x224] sm:$0xf]  ;;  %v1188_v12 = vld [vmem:[#allocation5 + $0x228] sm:$0xf0] }
  0x41   :  { %v1215_v49 = vor.u32 %v1370_v38, %v1212_v39  ;;  %654 = vmatpush.bf16.msrb.mxu2 %v1155_v42  ;;  %v1581_v13 = vld [vmem:[#allocation8 + $0x8] sm:$0xff]  ;;  %v97_v15 = vperm.slane %v1579_v10, 0  ;;  %v1191_v16 = vor.u32 %v1364_v11, %v1188_v12  ;;  %v1130_v28 = vld [vmem:[#allocation5 + $0x1b0] sm:$0xf]  ;;  %v1350_v30 = vld [vmem:[#allocation5 + $0x1b4] sm:$0xf] }
  0x42   :  { %v1132_v32 = vld [vmem:[#allocation5 + $0x1b8] sm:$0xf0]  ;;  %v1178_v34 = vld [vmem:[#allocation5 + $0x210] sm:$0xf]  ;;  %v1122_v40 = vld [vmem:[#allocation5 + $0x1a0] sm:$0xf] }
  0x43   :  { %432 = vmatpush.bf16.msrb.mxu0 %v1015_v44  ;;  %v1156_v44 = vld [vmem:[#allocation5 + $0x1e8] sm:$0xf0]  ;;  %v1180_v38 = vld [vmem:[#allocation5 + $0x218] sm:$0xf0]  ;;  %v1349_v41 = vld [vmem:[#allocation5 + $0x1a4] sm:$0xf0] }
  0x44   :  { %445 = vmatpush.bf16.msrb.mxu1 %v1079_v45  ;;  %667 = vmatpush.bf16.msrb.mxu3 %v1219_v29  ;;  %v1211_v45 = vor.u32 %v1371_v37, %v1210_v36  ;;  %v1159_v46 = vor.u32 %v1356_v43, %v1156_v44  ;;  %v1351_v29 = vld [vmem:[#allocation5 + $0x1b4] sm:$0xf0]  ;;  %v1362_v36 = vld [vmem:[#allocation5 + $0x214] sm:$0xf]  ;;  %v1348_v42 = vld [vmem:[#allocation5 + $0x1a4] sm:$0xf]  ;;  %v1123_v43 = vor.u32 %v1349_v41, %v1122_v40 }
  0x45   :  { %v1131_v31 = vor.u32 %v1351_v29, %v1130_v28  ;;  %v1183_v39 = vor.u32 %v1362_v36, %v1180_v38  ;;  %v1124_v44 = vld [vmem:[#allocation5 + $0x1a8] sm:$0xf0]  ;;  %v1361_v47 = vld [vmem:[#allocation5 + $0x204] sm:$0xf0]  ;;  %v1360_v48 = vld [vmem:[#allocation5 + $0x204] sm:$0xf] }
  0x46   :  { %v1347_v53 = vld [vmem:[#allocation5 + $0x194] sm:$0xf0]  ;;  %v1106_v58 = vld [vmem:[#allocation5 + $0x180] sm:$0xf]  ;;  %v1344_v60 = vld [vmem:[#allocation5 + $0x184] sm:$0xf] }
  0x47   :  { %433 = vmatpush.bf16.msrb.mxu0 %v1007_v50  ;;  %v1146_v50 = vld [vmem:[#allocation5 + $0x1d0] sm:$0xf]  ;;  %v1391_v0 = vld [vmem:[#allocation7 + $0x78] sm:$0xff]  ;;  %v1380_v28 = vld [vmem:[#allocation7 + $0x20] sm:$0xff]  ;;  %s900_s13 = sshll.u32 %s1597_s4, 4  ;;  %s901_s13 = int_to_ptr.hbm [resolvable:$true] %s900_s13 }
  0x48   :  { %446 = vmatpush.bf16.msrb.mxu1 %v1071_v51  ;;  %v1355_v51 = vld [vmem:[#allocation5 + $0x1d4] sm:$0xf0]  ;;  %668 = vmatpush.bf16.msrb.mxu3 %v1211_v45  ;;  %v1127_v45 = vor.u32 %v1348_v42, %v1124_v44  ;;  %v1386_v29 = vld [vmem:[#allocation7 + $0x50] sm:$0xff] }
  0x49   :  { %v1383_v1 = vld [vmem:[#allocation7 + $0x38] sm:$0xff] }
  0x4b   :  { %434 = vmatpush.bf16.msrb.mxu0 %v999_v56  ;;  %v1147_v56 = vor.u32 %v1355_v51, %v1146_v50  ;;  %v1172_v50 = vld [vmem:[#allocation5 + $0x208] sm:$0xf0] }
  0x4c   :  { %447 = vmatpush.bf16.msrb.mxu1 %v1063_v57  ;;  %v1151_v57 = vor.u32 %v1354_v52, %v1148_v55  ;;  %669 = vmatpush.bf16.msrb.mxu3 %v1203_v59  ;;  %v1175_v51 = vor.u32 %v1360_v48, %v1172_v50  ;;  %v1114_v52 = vld [vmem:[#allocation5 + $0x190] sm:$0xf]  ;;  %v1346_v55 = vld [vmem:[#allocation5 + $0x194] sm:$0xf]  ;;  %v1345_v59 = vld [vmem:[#allocation5 + $0x184] sm:$0xf0] }
  0x4d   :  { %655 = vmatpush.bf16.msrb.mxu2 %v1147_v56  ;;  %v1115_v54 = vor.u32 %v1347_v53, %v1114_v52  ;;  %v1116_v56 = vld [vmem:[#allocation5 + $0x198] sm:$0xf0] }
  0x4f   :  { %435 = vmatpush.bf16.msrb.mxu0 %v991_v3  ;;  %v1196_v3 = vld [vmem:[#allocation5 + $0x238] sm:$0xf0] }
  0x50   :  { %448 = vmatpush.bf16.msrb.mxu1 %v1055_v5  ;;  %v1143_v5 = vor.u32 %v1352_v61, %v1140_v62  ;;  %v1199_v7 = vor.u32 %v1366_v2, %v1196_v3  ;;  %670 = vmatpush.bf16.msrb.mxu3 %v1195_v6  ;;  %v1107_v61 = vor.u32 %v1345_v59, %v1106_v58  ;;  %v1108_v62 = vld [vmem:[#allocation5 + $0x188] sm:$0xf0]  ;;  %v1390_v2 = vld [vmem:[#allocation7 + $0x70] sm:$0xff]  ;;  %v1388_v6 = vld [vmem:[#allocation7 + $0x60] sm:$0xff] }
  0x51   :  { %656 = vmatpush.bf16.msrb.mxu2 %v1139_v4  ;;  %v1382_v3 = vld [vmem:[#allocation7 + $0x30] sm:$0xff]  ;;  %v1389_v4 = vld [vmem:[#allocation7 + $0x68] sm:$0xff] }
  0x53   :  { %436 = vmatpush.bf16.msrb.mxu0 %v983_v14  ;;  %v1187_v14 = vor.u32 %v1365_v9, %v1186_v8 }
  0x54   :  { %449 = vmatpush.bf16.msrb.mxu1 %v1047_v17  ;;  %v98_v17 = vperm.slane %v1581_v13, 0 }
  0x55   :  { %671 = vmatpush.bf16.msrb.mxu3 %v1187_v14  ;;  %657 = vmatpush.bf16.msrb.mxu2 %v1131_v31  ;;  %v241_v14 = vperm.slane %v1579_v10, 1  ;;  %v1385_v31 = vld [vmem:[#allocation7 + $0x48] sm:$0xff] }
  0x57   :  { %679 = vmatpush.bf16.msra.mxu0 %v1167_v35  ;;  %v1363_v35 = vld [vmem:[#allocation5 + $0x214] sm:$0xf0] }
  0x58   :  { %692 = vmatpush.bf16.msra.mxu1 %v1231_v25  ;;  %v1179_v37 = vor.u32 %v1363_v35, %v1178_v34  ;;  %v1377_v34 = vld [vmem:[#allocation7 + $0x8] sm:$0xff]  ;;  %v1376_v35 = vld [vmem:[#allocation7] sm:$0xff] }
  0x59   :  { %658 = vmatpush.bf16.msrb.mxu2 %v1123_v43  ;;  %v491_v43 = vperm.slane %v1579_v10, 2 }
  0x5a   :  { %672 = vmatpush.bf16.msrb.mxu3 %v1179_v37  ;;  %v492_v37 = vperm.slane %v1581_v13, 2 }
  0x5b   :  { %680 = vmatpush.bf16.msra.mxu0 %v1159_v46  ;;  %v1170_v46 = vld [vmem:[#allocation5 + $0x200] sm:$0xf] }
  0x5c   :  { %693 = vmatpush.bf16.msra.mxu1 %v1223_v33  ;;  %v1135_v33 = vor.u32 %v1350_v30, %v1132_v32  ;;  %v1379_v30 = vld [vmem:[#allocation7 + $0x18] sm:$0xff]  ;;  %v1378_v32 = vld [vmem:[#allocation7 + $0x10] sm:$0xff] }
  0x5d   :  { %659 = vmatpush.bf16.msrb.mxu2 %v1115_v54  ;;  %v864_v54 = vlaneseq }
  0x5f   :  { %681 = vmatpush.bf16.msra.mxu0 %v1151_v57  ;;  %v1119_v57 = vor.u32 %v1346_v55, %v1116_v56  ;;  %v741_v55 = vperm.slane %v1579_v10, 3  ;;  %v865_v56 = vand.u32 127, %v864_v54 }
  0x60   :  { %694 = vmatpush.bf16.msra.mxu1 %v1215_v49  ;;  %v1171_v49 = vor.u32 %v1361_v47, %v1170_v46 }
  0x61   :  { %660 = vmatpush.bf16.msrb.mxu2 %v1107_v61  ;;  %vm866_vm0 = vcmp.lt.s32.totalorder %v865_v56, 25  ;;  %vm890_vm5 = vcmp.eq.s32.totalorder %v865_v56, 25 }
  0x62   :  { %673 = vmatpush.bf16.msrb.mxu3 %v1171_v49 }
  0x63   :  { %682 = vmatpush.bf16.msra.mxu0 %v1143_v5  ;;  %v1381_v5 = vld [vmem:[#allocation7 + $0x28] sm:$0xff] }
  0x64   :  { %695 = vmatpush.bf16.msra.mxu1 %v1207_v63  ;;  %v1111_v63 = vor.u32 %v1344_v60, %v1108_v62 }
  0x67   :  { %683 = vmatpush.bf16.msra.mxu0 %v1135_v33  ;;  %v1384_v33 = vld [vmem:[#allocation7 + $0x40] sm:$0xff] }
  0x68   :  { %696 = vmatpush.bf16.msra.mxu1 %v1199_v7  ;;  %v242_v7 = vperm.slane %v1581_v13, 1 }
  0x6b   :  { %684 = vmatpush.bf16.msra.mxu0 %v1127_v45 }
  0x6c   :  { %697 = vmatpush.bf16.msra.mxu1 %v1191_v16 }
  0x6f   :  { %685 = vmatpush.bf16.msra.mxu0 %v1119_v57 }
  0x70   :  { %698 = vmatpush.bf16.msra.mxu1 %v1183_v39 }
  0x73   :  { %686 = vmatpush.bf16.msra.mxu0 %v1111_v63 }
  0x74   :  { %699 = vmatpush.bf16.msra.mxu1 %v1175_v51 }
  0xb3   :  { %v188_v18 = vpop.f32.mrf.mxu0 }
  0xb4   :  { %v189_v19 = vadd.f32 %v188_v18, %v97_v15  ;;  %v201_v20 = vpop.f32.mrf.mxu1 }
  0xb5   :  { %v202_v21 = vadd.f32 %v201_v20, %v98_v17 }
  0xb6   :  { %v205_v22 = vmax.f32 %v189_v19, 0.0 }
  0xb7   :  { %v206_v23 = vmax.f32 %v202_v21, 0.0 }
  0xb8   :  { %v207_v24 = vpack.c.bf16 %v205_v22, %v205_v22 }
  0xb9   :  { %v208_v25 = vpack.c.bf16 %v206_v23, %v206_v23 }
  0xba   :  { %411 = vmatmul.bf16.vlgmr.msra.gmra.mxu2 %v207_v24  ;;  %437 = vmatmul.bf16.vlgmr.msrb.gmra.mxu0 %v207_v24 }
  0xbb   :  { %424 = vmatmul.bf16.vlgmr.msra.gmra.mxu3 %v208_v25  ;;  %450 = vmatmul.bf16.vlgmr.msrb.gmra.mxu1 %v208_v25  ;;  %v190_v26 = vpop.f32.mrf.mxu0 }
  0xbc   :  { %v203_v27 = vpop.f32.mrf.mxu1  ;;  %851 = vmatpush.bf16.msra.mxu3 %v1391_v0  ;;  %838 = vmatpush.bf16.msra.mxu2 %v1383_v1 }
  0xbd   :  { %v1387_v27 = vld [vmem:[#allocation7 + $0x58] sm:$0xff] }
  0xc0   :  { %852 = vmatpush.bf16.msra.mxu3 %v1390_v2  ;;  %839 = vmatpush.bf16.msra.mxu2 %v1382_v3 }
  0xc4   :  { %853 = vmatpush.bf16.msra.mxu3 %v1389_v4  ;;  %840 = vmatpush.bf16.msra.mxu2 %v1381_v5 }
  0xc8   :  { %854 = vmatpush.bf16.msra.mxu3 %v1388_v6  ;;  %841 = vmatpush.bf16.msra.mxu2 %v1380_v28 }
  0xcc   :  { %855 = vmatpush.bf16.msra.mxu3 %v1387_v27  ;;  %842 = vmatpush.bf16.msra.mxu2 %v1379_v30 }
  0xd0   :  { %856 = vmatpush.bf16.msra.mxu3 %v1386_v29  ;;  %843 = vmatpush.bf16.msra.mxu2 %v1378_v32 }
  0xd4   :  { %857 = vmatpush.bf16.msra.mxu3 %v1385_v31  ;;  %844 = vmatpush.bf16.msra.mxu2 %v1377_v34 }
  0xd8   :  { %858 = vmatpush.bf16.msra.mxu3 %v1384_v33  ;;  %845 = vmatpush.bf16.msra.mxu2 %v1376_v35 }
 0x137   :  { %v438_v8 = vpop.f32.mrf.mxu0 }
 0x138   :  { %v439_v9 = vadd.f32 %v438_v8, %v242_v7  ;;  %v451_v11 = vpop.f32.mrf.mxu1 }
 0x13a   :  { %v452_v12 = vadd.f32 %v451_v11, %v439_v9 }
 0x13c   :  { %v456_v15 = vmax.f32 %v452_v12, 0.0 }
 0x13d   :  { %v412_v16 = vpop.f32.mrf.mxu2 }
 0x13e   :  { %v458_v17 = vpack.c.bf16 %v456_v15, %v456_v15  ;;  %v413_v18 = vadd.f32 %v412_v16, %v241_v14  ;;  %v425_v19 = vpop.f32.mrf.mxu3 }
 0x13f   :  { %v440_v20 = vpop.f32.mrf.mxu0 }
 0x140   :  { %v426_v21 = vadd.f32 %v425_v19, %v413_v18  ;;  %v453_v22 = vpop.f32.mrf.mxu1  ;;  %674 = vmatmul.bf16.vlgmr.msrb.gmra.mxu3 %v458_v17  ;;  %700 = vmatmul.bf16.vlgmr.msra.gmra.mxu1 %v458_v17 }
 0x142   :  { %v455_v23 = vmax.f32 %v426_v21, 0.0 }
 0x144   :  { %v457_v24 = vpack.c.bf16 %v455_v23, %v455_v23 }
 0x145   :  { %v414_v25 = vpop.f32.mrf.mxu2 }
 0x146   :  { %v427_v26 = vpop.f32.mrf.mxu3  ;;  %661 = vmatmul.bf16.vlgmr.msrb.gmra.mxu2 %v457_v24  ;;  %687 = vmatmul.bf16.vlgmr.msra.gmra.mxu0 %v457_v24 }
 0x1bd   :  { %v701_v36 = vpop.f32.mrf.mxu1 }
 0x1c3   :  { %v675_v38 = vpop.f32.mrf.mxu3  ;;  %v688_v39 = vpop.f32.mrf.mxu0 }
 0x1c4   :  { %v689_v40 = vadd.f32 %v688_v39, %v492_v37 }
 0x1c5   :  { %v703_v41 = vpop.f32.mrf.mxu1 }
 0x1c6   :  { %v702_v42 = vadd.f32 %v701_v36, %v689_v40 }
 0x1c8   :  { %v706_v44 = vmax.f32 %v702_v42, 0.0 }
 0x1c9   :  { %v662_v45 = vpop.f32.mrf.mxu2 }
 0x1ca   :  { %v708_v46 = vpack.c.bf16 %v706_v44, %v706_v44  ;;  %v663_v47 = vadd.f32 %v662_v45, %v491_v43 }
 0x1cb   :  { %v677_v48 = vpop.f32.mrf.mxu3  ;;  %v690_v49 = vpop.f32.mrf.mxu0 }
 0x1cc   :  { %v676_v50 = vadd.f32 %v675_v38, %v663_v47  ;;  %859 = vmatmul.bf16.vlgmr.msra.gmra.mxu3 %v708_v46 }
 0x1ce   :  { %v705_v51 = vmax.f32 %v676_v50, 0.0 }
 0x1d0   :  { %v707_v52 = vpack.c.bf16 %v705_v51, %v705_v51 }
 0x1d1   :  { %v664_v53 = vpop.f32.mrf.mxu2 }
 0x1d2   :  { %846 = vmatmul.bf16.vlgmr.msra.gmra.mxu2 %v707_v52 }
 0x24f   :  { %v860_v13 = vpop.f32.mrf.mxu3 }
 0x255   :  { %v847_v57 = vpop.f32.mrf.mxu2 }
 0x256   :  { %v848_v58 = vadd.f32 %v847_v57, %v741_v55 }
 0x257   :  { %v862_v59 = vpop.f32.mrf.mxu3 }
 0x258   :  { %v861_v60 = vadd.f32 %v860_v13, %v848_v58 }
 0x25a   :  { %v867_v61 = vsel %vm866_vm0, %v861_v60, -1e+30 }
 0x25b   :  { %868 = vmax.xlane.f32.xlu0 %v867_v61 }
 0x25d   :  { %v849_v62 = vpop.f32.mrf.mxu2 }
 0x2ce   :  { %v869_v63 = vpop.xlane.xlu0 %868 }
 0x2cf   :  { %v870_v0 = vsub.f32 %v867_v61, %v869_v63 }
 0x2d1   :  { %v871_v1 = vmul.f32 1.442695, %v870_v0 }
 0x2d3   :  { %1401 = vpow2.f32 %v871_v1 }
 0x2d9   :  { %v1402_v2 = vpop.eup %1401 }
 0x2da   :  { %873 = vadd.xlane.f32.xlu0 %v1402_v2 }
 0x34d   :  { %v874_v3 = vpop.xlane.xlu0 %873 }
 0x34e   :  { %1403 = vrcp.f32 %v874_v3  ;;  %v886_v6 = vand.u32 2147483648, %v874_v3  ;;  %v884_v8 = vand.u32 2147483647, %v874_v3  ;;  %vm880_vm2 = vweird.f32 %v874_v3 }
 0x350   :  { %v887_v11 = vor.u32 1.1754944e-38, %v886_v6  ;;  %vm885_vm4 = vcmp.eq.f32.partialorder %v884_v8, 8.507059e+37 }
 0x354   :  { %v1404_v4 = vpop.eup %1403 }
 0x355   :  { %v876_v5 = vmul.f32 %v1404_v4, %v874_v3  ;;  %vm881_vm1 = vweird.f32 %v1404_v4 }
 0x356   :  { %vm882_vm3 = vmor %vm880_vm2, %vm881_vm1 }
 0x357   :  { %v877_v10 = vsub.f32 1.0, %v876_v5 }
 0x359   :  { %v878_v7 = vmul.f32 %v1404_v4, %v877_v10 }
 0x35b   :  { %v879_v9 = vadd.f32 %v1404_v4, %v878_v7 }
 0x35d   :  { %v883_v12 = vsel %vm882_vm3, %v1404_v4, %v879_v9 }
 0x35e   :  { %v888_v14 = vsel %vm885_vm4, %v887_v11, %v883_v12 }
 0x35f   :  { %v889_v15 = vmul.f32 %v1402_v2, %v888_v14 }
 0x361   :  { %v891_v16 = vsel %vm890_vm5, %v861_v60, %v889_v15 }
 0x362   :  { %892 = vst [vmem:[#allocation10] sm:$0xff] %v891_v16 }
 0x363   :  { %903 = dma.vmem_to_hbm [thread:$0]  %s899_s3, 128, %s901_s13, [#allocation4]  }
 0x364   :  { %1531 = dma.done.wait [#allocation4], 128  }
 0x365   :  { %1532 = vsyncadd [#allocation4], 4294967168 }
 0x366   :  { %908 = vsyncpa [#allocation3], 1 }
 0x367   :  { %909 = vsyncpa [#allocation6], 1 }
 0x368   :  { %910 = vsyncpa [#allocation9], 1 }
 0x369   :  { %911 = vsyncpa [#allocation4], 1 }

</bundles_post_ra>
